<compile_context>
chip_gen: v7x
topology: tpu7x:2x2x1
jax: 0.10.0
libtpu: 0.0.40
codegen_flags: <defaults>
</compile_context>

<pallas_src>
import jax
import jax.numpy as jnp
from jax.experimental import pallas as pl
from jax.experimental.pallas import tpu as pltpu

_EPS = 1e-5


# ------------------------------ kernel helpers ------------------------------

def _bn_relu_rows(acc, gamma, beta):
    """Training-mode BatchNorm over rows (= N*Ho*Wo) per channel, then ReLU (f32)."""
    mean = jnp.mean(acc, axis=0, keepdims=True)
    var = jnp.mean(jnp.square(acc - mean), axis=0, keepdims=True)
    y = (acc - mean) * jax.lax.rsqrt(var + _EPS) * gamma + beta
    return jnp.maximum(y, 0.0)


def _make_resblock_kernel(n, ho, wo, cmed, has_proj, mxu_dtype):
    """Fused ResBlock forward.

    conv1: single im2col matmul (K = 9*Cin) + bias, BN1 (batch stats), ReLU
    conv2: y1 -> zero-padded VMEM scratch -> single matmul (K = 9*Cmed) + bias,
           BN2, ReLU
    out  = conv2 path + residual (1x1 projection matmul, or identity add)
    """
    m = n * ho * wo

    def kernel(*refs):
        if has_proj:
            (cols1_ref, w1_ref, cb1_ref, g1_ref, be1_ref,
             w2_ref, cb2_ref, g2_ref, be2_ref,
             xres_ref, wr_ref, br_ref,
             out_ref, y1p_ref) = refs
        else:
            (cols1_ref, w1_ref, cb1_ref, g1_ref, be1_ref,
             w2_ref, cb2_ref, g2_ref, be2_ref,
             xres_ref,
             out_ref, y1p_ref) = refs

        # ---- conv1 + bias: one MXU matmul (bf16 operands, f32 accumulate) ----
        acc1 = jnp.dot(cols1_ref[...], w1_ref[...],
                       preferred_element_type=jnp.float32) + cb1_ref[...]
        y1 = _bn_relu_rows(acc1, g1_ref[...], be1_ref[...])          # (m, cmed) f32

        # ---- inter-conv "padding=1": y1 stays in VMEM (no HBM round-trip) ----
        y1p_ref[...] = jnp.zeros_like(y1p_ref)
        y1p_ref[:, 1:ho + 1, 1:wo + 1, :] = y1.reshape(n, ho, wo, cmed)

        # ---- conv2 + bias: build (m, 9*cmed) im2col operand, one matmul ----
        wins = []
        for k in range(9):
            dy, dx = divmod(k, 3)
            wins.append(y1p_ref[:, dy:dy + ho, dx:dx + wo, :].reshape(m, cmed))
        cols2 = jnp.concatenate(wins, axis=-1).astype(mxu_dtype)     # (m, 9*cmed)
        acc2 = jnp.dot(cols2, w2_ref[...],
                       preferred_element_type=jnp.float32) + cb2_ref[...]
        y2 = _bn_relu_rows(acc2, g2_ref[...], be2_ref[...])          # (m, cout) f32

        # ---- residual branch ----
        if has_proj:
            res = jnp.dot(xres_ref[...], wr_ref[...],
                          preferred_element_type=jnp.float32) + br_ref[...]
        else:
            res = xres_ref[...]        # identity shortcut: plain elementwise add
        out_ref[...] = (y2 + res).astype(out_ref.dtype)

    return kernel


# ------------------------------- pallas glue --------------------------------

def _full_spec(shape):
    nd = len(shape)
    return pl.BlockSpec(shape, lambda i, _nd=nd: (0,) * _nd)


def _im2col_3x3(xp, ho, wo, stride):
    """(N, H+2, W+2, C) padded NHWC -> (N*Ho*Wo, 9*C) im2col, tap-major rows.
    The conv stride is folded into the window extraction (no 9x taps tensor)."""
    n, _, _, c = xp.shape
    taps = []
    for dy in range(3):
        for dx in range(3):
            taps.append(jax.lax.slice(
                xp,
                (0, dy, dx, 0),
                (n, dy + (ho - 1) * stride + 1, dx + (wo - 1) * stride + 1, c),
                (1, stride, stride, 1)))
    return jnp.concatenate(taps, axis=-1).reshape(n * ho * wo, 9 * c)


# -------------------------------- the module --------------------------------

class ResBlockPallas:
    """Pallas-TPU implementation of the PyTorch ResBlock forward pass."""

    def __init__(self, in_ch, med_ch, out_ch, downsample=False, *,
                 key, mxu_dtype=jnp.bfloat16):
        self.in_ch, self.med_ch, self.out_ch = in_ch, med_ch, out_ch
        self.stride = 2 if downsample else 1
        self.mxu_dtype = mxu_dtype
        ks = jax.random.split(key, 10)

        def conv_w(k, co, ci, kh, kw):
            fan = ci * kh * kw
            return jax.random.normal(k, (co, ci, kh, kw), jnp.float32) / (fan ** 0.5)

        # PyTorch-layout parameters (OIHW), deterministic synthetic init.
        self.w1 = conv_w(ks[0], med_ch, in_ch, 3, 3)
        self.cb1 = 0.1 * jax.random.normal(ks[1], (med_ch,), jnp.float32)
        self.g1 = 1.0 + 0.1 * jax.random.normal(ks[2], (med_ch,), jnp.float32)
        self.be1 = 0.1 * jax.random.normal(ks[3], (med_ch,), jnp.float32)
        self.w2 = conv_w(ks[4], out_ch, med_ch, 3, 3)
        self.cb2 = 0.1 * jax.random.normal(ks[5], (out_ch,), jnp.float32)
        self.g2 = 1.0 + 0.1 * jax.random.normal(ks[6], (out_ch,), jnp.float32)
        self.be2 = 0.1 * jax.random.normal(ks[7], (out_ch,), jnp.float32)
        if in_ch != out_ch:
            self.wr = conv_w(ks[8], out_ch, in_ch, 1, 1)
            self.br = 0.1 * jax.random.normal(ks[9], (out_ch,), jnp.float32)
        else:
            self.wr, self.br = None, None

        # Kernel-layout parameters: conv weights as (9*Cin, Cout) rows matching
        # the tap-major im2col, cast to the MXU operand dtype (bf16).
        self.w1_t = (jnp.transpose(self.w1, (2, 3, 1, 0))
                     .reshape(9 * in_ch, med_ch).astype(mxu_dtype))
        self.w2_t = (jnp.transpose(self.w2, (2, 3, 1, 0))
                     .reshape(9 * med_ch, out_ch).astype(mxu_dtype))
        self.cb1_t, self.g1_t, self.be1_t = (v.reshape(1, med_ch)
                                             for v in (self.cb1, self.g1, self.be1))
        self.cb2_t, self.g2_t, self.be2_t = (v.reshape(1, out_ch)
                                             for v in (self.cb2, self.g2, self.be2))
        if self.wr is not None:
            self.wr_t = self.wr.reshape(out_ch, in_ch).T.astype(mxu_dtype)
            self.br_t = self.br.reshape(1, out_ch)

        self._jit_forward = jax.jit(self._forward)

    def _forward(self, x_nchw):
        x = jnp.transpose(x_nchw, (0, 2, 3, 1)).astype(jnp.float32)   # -> NHWC
        n, h, w, _ = x.shape
        s = self.stride
        ho = (h - 1) // s + 1
        wo = (w - 1) // s + 1
        m = n * ho * wo

        xp = jnp.pad(x, ((0, 0), (1, 1), (1, 1), (0, 0)))
        cols1 = _im2col_3x3(xp, ho, wo, s).astype(self.mxu_dtype)     # (m, 9*Cin)

        has_proj = self.wr is not None
        inputs = [cols1, self.w1_t, self.cb1_t, self.g1_t, self.be1_t,
                  self.w2_t, self.cb2_t, self.g2_t, self.be2_t]
        if has_proj:
            xres = x[:, ::s, ::s, :].reshape(m, self.in_ch).astype(self.mxu_dtype)
            inputs += [xres, self.wr_t, self.br_t]
        else:
            # identity shortcut (in_ch == out_ch, stride 1): exact f32 add in-kernel
            xres = x.reshape(m, self.out_ch)
            inputs += [xres]

        kernel = _make_resblock_kernel(n, ho, wo, self.med_ch, has_proj,
                                       self.mxu_dtype)
        out2d = pl.pallas_call(
            kernel,
            out_shape=jax.ShapeDtypeStruct((m, self.out_ch), jnp.float32),
            grid=(1,),
            in_specs=[_full_spec(a.shape) for a in inputs],
            out_specs=_full_spec((m, self.out_ch)),
            scratch_shapes=[pltpu.VMEM((n, ho + 2, wo + 2, self.med_ch),
                                       jnp.float32)],
            compiler_params=pltpu.CompilerParams(
                dimension_semantics=("arbitrary",)),
        )(*inputs)

        out = out2d.reshape(n, ho, wo, self.out_ch)
        return jnp.transpose(out, (0, 3, 1, 2))                       # -> NCHW

    def __call__(self, x_nchw):
        return self._jit_forward(x_nchw)

    def torch_params(self):
        return dict(w1=self.w1, cb1=self.cb1, g1=self.g1, be1=self.be1,
                    w2=self.w2, cb2=self.cb2, g2=self.g2, be2=self.be2,
                    wr=self.wr, br=self.br)


# ------------------------------ pure-JAX reference ---------------------------

def _ref_resblock(x_nchw, p, stride, has_proj, mxu_dtype=jnp.bfloat16):
    """XLA reference using the same numerical recipe as the kernel:
    mxu_dtype conv operands, f32 accumulation, f32 batch-stat BatchNorm."""
    dn = ('NCHW', 'OIHW', 'NCHW')

    def conv(x, w, b, s, pad):
        y = jax.lax.conv_general_dilated(
            x.astype(mxu_dtype), w.astype(mxu_dtype),
            window_strides=(s, s), padding=[(pad, pad), (pad, pad)],
            dimension_numbers=dn, preferred_element_type=jnp.float32)
        return y + b.reshape(1, -1, 1, 1)

    def bn_relu(y, g, b):
        mean = jnp.mean(y, axis=(0, 2, 3), keepdims=True)
        var = jnp.mean(jnp.square(y - mean), axis=(0, 2, 3), keepdims=True)
        yn = ((y - mean) * jax.lax.rsqrt(var + _EPS) * g.reshape(1, -1, 1, 1)
              + b.reshape(1, -1, 1, 1))
        return jnp.maximum(yn, 0.0)

    y = bn_relu(conv(x_nchw, p['w1'], p['cb1'], stride, 1), p['g1'], p['be1'])
    y = bn_relu(conv(y, p['w2'], p['cb2'], 1, 1), p['g2'], p['be2'])
    res = conv(x_nchw, p['wr'], p['br'], stride, 0) if has_proj else x_nchw
    return y + res


# ------------------------------------ main -----------------------------------

if __name__ == "__main__":
    key = jax.random.PRNGKey(0)
    kx, kp1, kp2 = jax.random.split(key, 3)
    x = jax.random.normal(kx, (2, 4, 16, 16), jnp.float32)   # NCHW, like PyTorch

    # Config A: projection residual + downsample  (ResBlock(4, 8, 16, DownSample=True))
    blk_a = ResBlockPallas(4, 8, 16, downsample=True, key=kp1)
    y_a = jax.block_until_ready(blk_a(x))
    r_a = _ref_resblock(x, blk_a.torch_params(), blk_a.stride, has_proj=True,
                        mxu_dtype=blk_a.mxu_dtype)
    ok_a = (bool(jnp.allclose(y_a, r_a, atol=2e-2, rtol=2e-2))
            and y_a.shape == (2, 16, 8, 8))

    # Config B: identity residual, no downsample  (ResBlock(4, 8, 4, DownSample=False))
    blk_b = ResBlockPallas(4, 8, 4, downsample=False, key=kp2)
    y_b = jax.block_until_ready(blk_b(x))
    r_b = _ref_resblock(x, blk_b.torch_params(), blk_b.stride, has_proj=False,
                        mxu_dtype=blk_b.mxu_dtype)
    ok_b = (bool(jnp.allclose(y_b, r_b, atol=2e-2, rtol=2e-2))
            and y_b.shape == (2, 4, 16, 16))

    if ok_a and ok_b:
        print("KERNEL_OK")
    else:
        print("MISMATCH",
              float(jnp.max(jnp.abs(y_a - r_a))),
              float(jnp.max(jnp.abs(y_b - r_b))))
</pallas_src>

<mosaic_0001>
module attributes {stable_mosaic.version = 11 : i64} {
  func.func @kernel(%arg0: i32, %arg1: memref<128x36xbf16, #tpu.memory_space<vmem>>, %arg2: memref<36x8xbf16, #tpu.memory_space<vmem>>, %arg3: memref<1x8xf32, #tpu.memory_space<vmem>>, %arg4: memref<1x8xf32, #tpu.memory_space<vmem>>, %arg5: memref<1x8xf32, #tpu.memory_space<vmem>>, %arg6: memref<72x16xbf16, #tpu.memory_space<vmem>>, %arg7: memref<1x16xf32, #tpu.memory_space<vmem>>, %arg8: memref<1x16xf32, #tpu.memory_space<vmem>>, %arg9: memref<1x16xf32, #tpu.memory_space<vmem>>, %arg10: memref<128x4xbf16, #tpu.memory_space<vmem>>, %arg11: memref<4x16xbf16, #tpu.memory_space<vmem>>, %arg12: memref<1x16xf32, #tpu.memory_space<vmem>>, %arg13: memref<128x16xf32, #tpu.memory_space<vmem>>, %arg14: memref<2x10x10x8xf32, #tpu.memory_space<vmem>>) attributes {dimension_semantics = [#tpu.dimension_semantics<arbitrary>], iteration_bounds = array<i64: 1>, scalar_prefetch = 0 : i64, scratch_operands = 1 : i64, tpu.core_type = #tpu.core_type<tc>, window_params = [{pipeline_mode = #tpu.pipeline_mode<synchronous>, transform_indices = @transform_0, window_bounds = array<i64: 128, 36>}, {pipeline_mode = #tpu.pipeline_mode<synchronous>, transform_indices = @transform_1, window_bounds = array<i64: 36, 8>}, {pipeline_mode = #tpu.pipeline_mode<synchronous>, transform_indices = @transform_2, window_bounds = array<i64: 1, 8>}, {pipeline_mode = #tpu.pipeline_mode<synchronous>, transform_indices = @transform_3, window_bounds = array<i64: 1, 8>}, {pipeline_mode = #tpu.pipeline_mode<synchronous>, transform_indices = @transform_4, window_bounds = array<i64: 1, 8>}, {pipeline_mode = #tpu.pipeline_mode<synchronous>, transform_indices = @transform_5, window_bounds = array<i64: 72, 16>}, {pipeline_mode = #tpu.pipeline_mode<synchronous>, transform_indices = @transform_6, window_bounds = array<i64: 1, 16>}, {pipeline_mode = #tpu.pipeline_mode<synchronous>, transform_indices = @transform_7, window_bounds = array<i64: 1, 16>}, {pipeline_mode = #tpu.pipeline_mode<synchronous>, transform_indices = @transform_8, window_bounds = array<i64: 1, 16>}, {pipeline_mode = #tpu.pipeline_mode<synchronous>, transform_indices = @transform_9, window_bounds = array<i64: 128, 4>}, {pipeline_mode = #tpu.pipeline_mode<synchronous>, transform_indices = @transform_10, window_bounds = array<i64: 4, 16>}, {pipeline_mode = #tpu.pipeline_mode<synchronous>, transform_indices = @transform_11, window_bounds = array<i64: 1, 16>}, {pipeline_mode = #tpu.pipeline_mode<synchronous>, transform_indices = @transform_12, window_bounds = array<i64: 128, 16>}]} {
    %c0 = arith.constant 0 : index
    %c0_0 = arith.constant 0 : index
    %0 = vector.load %arg1[%c0, %c0_0] : memref<128x36xbf16, #tpu.memory_space<vmem>>, vector<128x36xbf16>
    %c0_1 = arith.constant 0 : index
    %c0_2 = arith.constant 0 : index
    %1 = vector.load %arg2[%c0_1, %c0_2] : memref<36x8xbf16, #tpu.memory_space<vmem>>, vector<36x8xbf16>
    %cst = arith.constant dense<0.000000e+00> : vector<128x8xf32>
    %2 = tpu.matmul %0, %1, %cst {dimension_numbers = #tpu.dot_dimension_numbers<[1], [0], [0], [1], [0, 0, 1, 1], [], []>} : vector<128x36xbf16>, vector<36x8xbf16>, vector<128x8xf32> -> vector<128x8xf32>
    %c0_3 = arith.constant 0 : index
    %c0_4 = arith.constant 0 : index
    %3 = vector.load %arg3[%c0_3, %c0_4] : memref<1x8xf32, #tpu.memory_space<vmem>>, vector<1x8xf32>
    %4 = vector.broadcast %3 : vector<1x8xf32> to vector<128x8xf32>
    %5 = arith.addf %2, %4 : vector<128x8xf32>
    %c0_5 = arith.constant 0 : index
    %c0_6 = arith.constant 0 : index
    %6 = vector.load %arg4[%c0_5, %c0_6] : memref<1x8xf32, #tpu.memory_space<vmem>>, vector<1x8xf32>
    %c0_7 = arith.constant 0 : index
    %c0_8 = arith.constant 0 : index
    %7 = vector.load %arg5[%c0_7, %c0_8] : memref<1x8xf32, #tpu.memory_space<vmem>>, vector<1x8xf32>
    %cst_9 = arith.constant dense<0.000000e+00> : vector<8xf32>
    %8 = vector.multi_reduction <add>, %5, %cst_9 [0] : vector<128x8xf32> to vector<8xf32>
    %9 = vector.shape_cast %8 : vector<8xf32> to vector<1x8xf32>
    %cst_10 = arith.constant 1.280000e+02 : f32
    %10 = vector.broadcast %cst_10 : f32 to vector<1x8xf32>
    %11 = arith.divf %9, %10 : vector<1x8xf32>
    %12 = vector.broadcast %11 : vector<1x8xf32> to vector<128x8xf32>
    %13 = arith.subf %5, %12 : vector<128x8xf32>
    %14 = arith.mulf %13, %13 : vector<128x8xf32>
    %cst_11 = arith.constant dense<0.000000e+00> : vector<8xf32>
    %15 = vector.multi_reduction <add>, %14, %cst_11 [0] : vector<128x8xf32> to vector<8xf32>
    %16 = vector.shape_cast %15 : vector<8xf32> to vector<1x8xf32>
    %cst_12 = arith.constant 1.280000e+02 : f32
    %17 = vector.broadcast %cst_12 : f32 to vector<1x8xf32>
    %18 = arith.divf %16, %17 : vector<1x8xf32>
    %19 = vector.broadcast %11 : vector<1x8xf32> to vector<128x8xf32>
    %20 = arith.subf %5, %19 : vector<128x8xf32>
    %cst_13 = arith.constant 9.99999974E-6 : f32
    %21 = vector.broadcast %cst_13 : f32 to vector<1x8xf32>
    %22 = arith.addf %18, %21 : vector<1x8xf32>
    %23 = math.rsqrt %22 : vector<1x8xf32>
    %24 = vector.broadcast %23 : vector<1x8xf32> to vector<128x8xf32>
    %25 = arith.mulf %20, %24 : vector<128x8xf32>
    %26 = vector.broadcast %6 : vector<1x8xf32> to vector<128x8xf32>
    %27 = arith.mulf %25, %26 : vector<128x8xf32>
    %28 = vector.broadcast %7 : vector<1x8xf32> to vector<128x8xf32>
    %29 = arith.addf %27, %28 : vector<128x8xf32>
    %cst_14 = arith.constant 0.000000e+00 : f32
    %30 = vector.broadcast %cst_14 : f32 to vector<128x8xf32>
    %31 = arith.maximumf %29, %30 : vector<128x8xf32>
    %cst_15 = arith.constant 0.000000e+00 : f32
    %32 = vector.broadcast %cst_15 : f32 to vector<2x10x10x8xf32>
    %c0_16 = arith.constant 0 : index
    %c0_17 = arith.constant 0 : index
    %c0_18 = arith.constant 0 : index
    %c0_19 = arith.constant 0 : index
    %33 = vector.load %arg14[%c0_16, %c0_17, %c0_18, %c0_19] : memref<2x10x10x8xf32, #tpu.memory_space<vmem>>, vector<2x10x10x8xf32>
    tpu.vector_store %arg14[%c0_16, %c0_17, %c0_18, %c0_19], %32 {strides = array<i32>} : memref<2x10x10x8xf32, #tpu.memory_space<vmem>>, vector<2x10x10x8xf32>,
    %34 = vector.shape_cast %31 : vector<128x8xf32> to vector<2x8x8x8xf32>
    %c0_20 = arith.constant 0 : index
    %c1 = arith.constant 1 : index
    %c1_21 = arith.constant 1 : index
    %c0_22 = arith.constant 0 : index
    %35 = vector.load %arg14[%c0_20, %c1, %c1_21, %c0_22] : memref<2x10x10x8xf32, #tpu.memory_space<vmem>>, vector<2x8x8x8xf32>
    tpu.vector_store %arg14[%c0_20, %c1, %c1_21, %c0_22], %34 {strides = array<i32>} : memref<2x10x10x8xf32, #tpu.memory_space<vmem>>, vector<2x8x8x8xf32>,
    %c0_23 = arith.constant 0 : index
    %c0_24 = arith.constant 0 : index
    %c0_25 = arith.constant 0 : index
    %c0_26 = arith.constant 0 : index
    %36 = vector.load %arg14[%c0_23, %c0_24, %c0_25, %c0_26] : memref<2x10x10x8xf32, #tpu.memory_space<vmem>>, vector<2x8x8x8xf32>
    %37 = vector.shape_cast %36 : vector<2x8x8x8xf32> to vector<128x8xf32>
    %c0_27 = arith.constant 0 : index
    %c0_28 = arith.constant 0 : index
    %c1_29 = arith.constant 1 : index
    %c0_30 = arith.constant 0 : index
    %38 = vector.load %arg14[%c0_27, %c0_28, %c1_29, %c0_30] : memref<2x10x10x8xf32, #tpu.memory_space<vmem>>, vector<2x8x8x8xf32>
    %39 = vector.shape_cast %38 : vector<2x8x8x8xf32> to vector<128x8xf32>
    %c0_31 = arith.constant 0 : index
    %c0_32 = arith.constant 0 : index
    %c2 = arith.constant 2 : index
    %c0_33 = arith.constant 0 : index
    %40 = vector.load %arg14[%c0_31, %c0_32, %c2, %c0_33] : memref<2x10x10x8xf32, #tpu.memory_space<vmem>>, vector<2x8x8x8xf32>
    %41 = vector.shape_cast %40 : vector<2x8x8x8xf32> to vector<128x8xf32>
    %c0_34 = arith.constant 0 : index
    %c1_35 = arith.constant 1 : index
    %c0_36 = arith.constant 0 : index
    %c0_37 = arith.constant 0 : index
    %42 = vector.load %arg14[%c0_34, %c1_35, %c0_36, %c0_37] : memref<2x10x10x8xf32, #tpu.memory_space<vmem>>, vector<2x8x8x8xf32>
    %43 = vector.shape_cast %42 : vector<2x8x8x8xf32> to vector<128x8xf32>
    %c0_38 = arith.constant 0 : index
    %c1_39 = arith.constant 1 : index
    %c1_40 = arith.constant 1 : index
    %c0_41 = arith.constant 0 : index
    %44 = vector.load %arg14[%c0_38, %c1_39, %c1_40, %c0_41] : memref<2x10x10x8xf32, #tpu.memory_space<vmem>>, vector<2x8x8x8xf32>
    %45 = vector.shape_cast %44 : vector<2x8x8x8xf32> to vector<128x8xf32>
    %c0_42 = arith.constant 0 : index
    %c1_43 = arith.constant 1 : index
    %c2_44 = arith.constant 2 : index
    %c0_45 = arith.constant 0 : index
    %46 = vector.load %arg14[%c0_42, %c1_43, %c2_44, %c0_45] : memref<2x10x10x8xf32, #tpu.memory_space<vmem>>, vector<2x8x8x8xf32>
    %47 = vector.shape_cast %46 : vector<2x8x8x8xf32> to vector<128x8xf32>
    %c0_46 = arith.constant 0 : index
    %c2_47 = arith.constant 2 : index
    %c0_48 = arith.constant 0 : index
    %c0_49 = arith.constant 0 : index
    %48 = vector.load %arg14[%c0_46, %c2_47, %c0_48, %c0_49] : memref<2x10x10x8xf32, #tpu.memory_space<vmem>>, vector<2x8x8x8xf32>
    %49 = vector.shape_cast %48 : vector<2x8x8x8xf32> to vector<128x8xf32>
    %c0_50 = arith.constant 0 : index
    %c2_51 = arith.constant 2 : index
    %c1_52 = arith.constant 1 : index
    %c0_53 = arith.constant 0 : index
    %50 = vector.load %arg14[%c0_50, %c2_51, %c1_52, %c0_53] : memref<2x10x10x8xf32, #tpu.memory_space<vmem>>, vector<2x8x8x8xf32>
    %51 = vector.shape_cast %50 : vector<2x8x8x8xf32> to vector<128x8xf32>
    %c0_54 = arith.constant 0 : index
    %c2_55 = arith.constant 2 : index
    %c2_56 = arith.constant 2 : index
    %c0_57 = arith.constant 0 : index
    %52 = vector.load %arg14[%c0_54, %c2_55, %c2_56, %c0_57] : memref<2x10x10x8xf32, #tpu.memory_space<vmem>>, vector<2x8x8x8xf32>
    %53 = vector.shape_cast %52 : vector<2x8x8x8xf32> to vector<128x8xf32>
    %54 = tpu.concatenate %37, %39, %41, %43, %45, %47, %49, %51, %53 in 1 : vector<128x8xf32>, vector<128x8xf32>, vector<128x8xf32>, vector<128x8xf32>, vector<128x8xf32>, vector<128x8xf32>, vector<128x8xf32>, vector<128x8xf32>, vector<128x8xf32> -> vector<128x72xf32>
    %55 = arith.truncf %54 : vector<128x72xf32> to vector<128x72xbf16>
    %c0_58 = arith.constant 0 : index
    %c0_59 = arith.constant 0 : index
    %56 = vector.load %arg6[%c0_58, %c0_59] : memref<72x16xbf16, #tpu.memory_space<vmem>>, vector<72x16xbf16>
    %cst_60 = arith.constant dense<0.000000e+00> : vector<128x16xf32>
    %57 = tpu.matmul %55, %56, %cst_60 {dimension_numbers = #tpu.dot_dimension_numbers<[1], [0], [0], [1], [0, 0, 1, 1], [], []>} : vector<128x72xbf16>, vector<72x16xbf16>, vector<128x16xf32> -> vector<128x16xf32>
    %c0_61 = arith.constant 0 : index
    %c0_62 = arith.constant 0 : index
    %58 = vector.load %arg7[%c0_61, %c0_62] : memref<1x16xf32, #tpu.memory_space<vmem>>, vector<1x16xf32>
    %59 = vector.broadcast %58 : vector<1x16xf32> to vector<128x16xf32>
    %60 = arith.addf %57, %59 : vector<128x16xf32>
    %c0_63 = arith.constant 0 : index
    %c0_64 = arith.constant 0 : index
    %61 = vector.load %arg8[%c0_63, %c0_64] : memref<1x16xf32, #tpu.memory_space<vmem>>, vector<1x16xf32>
    %c0_65 = arith.constant 0 : index
    %c0_66 = arith.constant 0 : index
    %62 = vector.load %arg9[%c0_65, %c0_66] : memref<1x16xf32, #tpu.memory_space<vmem>>, vector<1x16xf32>
    %cst_67 = arith.constant dense<0.000000e+00> : vector<16xf32>
    %63 = vector.multi_reduction <add>, %60, %cst_67 [0] : vector<128x16xf32> to vector<16xf32>
    %64 = vector.shape_cast %63 : vector<16xf32> to vector<1x16xf32>
    %cst_68 = arith.constant 1.280000e+02 : f32
    %65 = vector.broadcast %cst_68 : f32 to vector<1x16xf32>
    %66 = arith.divf %64, %65 : vector<1x16xf32>
    %67 = vector.broadcast %66 : vector<1x16xf32> to vector<128x16xf32>
    %68 = arith.subf %60, %67 : vector<128x16xf32>
    %69 = arith.mulf %68, %68 : vector<128x16xf32>
    %cst_69 = arith.constant dense<0.000000e+00> : vector<16xf32>
    %70 = vector.multi_reduction <add>, %69, %cst_69 [0] : vector<128x16xf32> to vector<16xf32>
    %71 = vector.shape_cast %70 : vector<16xf32> to vector<1x16xf32>
    %cst_70 = arith.constant 1.280000e+02 : f32
    %72 = vector.broadcast %cst_70 : f32 to vector<1x16xf32>
    %73 = arith.divf %71, %72 : vector<1x16xf32>
    %74 = vector.broadcast %66 : vector<1x16xf32> to vector<128x16xf32>
    %75 = arith.subf %60, %74 : vector<128x16xf32>
    %cst_71 = arith.constant 9.99999974E-6 : f32
    %76 = vector.broadcast %cst_71 : f32 to vector<1x16xf32>
    %77 = arith.addf %73, %76 : vector<1x16xf32>
    %78 = math.rsqrt %77 : vector<1x16xf32>
    %79 = vector.broadcast %78 : vector<1x16xf32> to vector<128x16xf32>
    %80 = arith.mulf %75, %79 : vector<128x16xf32>
    %81 = vector.broadcast %61 : vector<1x16xf32> to vector<128x16xf32>
    %82 = arith.mulf %80, %81 : vector<128x16xf32>
    %83 = vector.broadcast %62 : vector<1x16xf32> to vector<128x16xf32>
    %84 = arith.addf %82, %83 : vector<128x16xf32>
    %cst_72 = arith.constant 0.000000e+00 : f32
    %85 = vector.broadcast %cst_72 : f32 to vector<128x16xf32>
    %86 = arith.maximumf %84, %85 : vector<128x16xf32>
    %c0_73 = arith.constant 0 : index
    %c0_74 = arith.constant 0 : index
    %87 = vector.load %arg10[%c0_73, %c0_74] : memref<128x4xbf16, #tpu.memory_space<vmem>>, vector<128x4xbf16>
    %c0_75 = arith.constant 0 : index
    %c0_76 = arith.constant 0 : index
    %88 = vector.load %arg11[%c0_75, %c0_76] : memref<4x16xbf16, #tpu.memory_space<vmem>>, vector<4x16xbf16>
    %cst_77 = arith.constant dense<0.000000e+00> : vector<128x16xf32>
    %89 = tpu.matmul %87, %88, %cst_77 {dimension_numbers = #tpu.dot_dimension_numbers<[1], [0], [0], [1], [0, 0, 1, 1], [], []>} : vector<128x4xbf16>, vector<4x16xbf16>, vector<128x16xf32> -> vector<128x16xf32>
    %c0_78 = arith.constant 0 : index
    %c0_79 = arith.constant 0 : index
    %90 = vector.load %arg12[%c0_78, %c0_79] : memref<1x16xf32, #tpu.memory_space<vmem>>, vector<1x16xf32>
    %91 = vector.broadcast %90 : vector<1x16xf32> to vector<128x16xf32>
    %92 = arith.addf %89, %91 : vector<128x16xf32>
    %93 = arith.addf %86, %92 : vector<128x16xf32>
    %c0_80 = arith.constant 0 : index
    %c0_81 = arith.constant 0 : index
    %94 = vector.load %arg13[%c0_80, %c0_81] : memref<128x16xf32, #tpu.memory_space<vmem>>, vector<128x16xf32>
    tpu.vector_store %arg13[%c0_80, %c0_81], %93 {strides = array<i32>} : memref<128x16xf32, #tpu.memory_space<vmem>>, vector<128x16xf32>,
    return
  }
  func.func @transform_0(%arg0: i32) -> (i32, i32) {
    %c0_i32 = arith.constant 0 : i32
    %c0_i32_0 = arith.constant 0 : i32
    %c0_i32_1 = arith.constant 0 : i32
    return %c0_i32, %c0_i32_0 : i32, i32
  }
  func.func @transform_1(%arg0: i32) -> (i32, i32) {
    %c0_i32 = arith.constant 0 : i32
    %c0_i32_0 = arith.constant 0 : i32
    %c0_i32_1 = arith.constant 0 : i32
    return %c0_i32, %c0_i32_0 : i32, i32
  }
  func.func @transform_2(%arg0: i32) -> (i32, i32) {
    %c0_i32 = arith.constant 0 : i32
    %c0_i32_0 = arith.constant 0 : i32
    %c0_i32_1 = arith.constant 0 : i32
    return %c0_i32, %c0_i32_0 : i32, i32
  }
  func.func @transform_3(%arg0: i32) -> (i32, i32) {
    %c0_i32 = arith.constant 0 : i32
    %c0_i32_0 = arith.constant 0 : i32
    %c0_i32_1 = arith.constant 0 : i32
    return %c0_i32, %c0_i32_0 : i32, i32
  }
  func.func @transform_4(%arg0: i32) -> (i32, i32) {
    %c0_i32 = arith.constant 0 : i32
    %c0_i32_0 = arith.constant 0 : i32
    %c0_i32_1 = arith.constant 0 : i32
    return %c0_i32, %c0_i32_0 : i32, i32
  }
  func.func @transform_5(%arg0: i32) -> (i32, i32) {
    %c0_i32 = arith.constant 0 : i32
    %c0_i32_0 = arith.constant 0 : i32
    %c0_i32_1 = arith.constant 0 : i32
    return %c0_i32, %c0_i32_0 : i32, i32
  }
  func.func @transform_6(%arg0: i32) -> (i32, i32) {
    %c0_i32 = arith.constant 0 : i32
    %c0_i32_0 = arith.constant 0 : i32
    %c0_i32_1 = arith.constant 0 : i32
    return %c0_i32, %c0_i32_0 : i32, i32
  }
  func.func @transform_7(%arg0: i32) -> (i32, i32) {
    %c0_i32 = arith.constant 0 : i32
    %c0_i32_0 = arith.constant 0 : i32
    %c0_i32_1 = arith.constant 0 : i32
    return %c0_i32, %c0_i32_0 : i32, i32
  }
  func.func @transform_8(%arg0: i32) -> (i32, i32) {
    %c0_i32 = arith.constant 0 : i32
    %c0_i32_0 = arith.constant 0 : i32
    %c0_i32_1 = arith.constant 0 : i32
    return %c0_i32, %c0_i32_0 : i32, i32
  }
  func.func @transform_9(%arg0: i32) -> (i32, i32) {
    %c0_i32 = arith.constant 0 : i32
    %c0_i32_0 = arith.constant 0 : i32
    %c0_i32_1 = arith.constant 0 : i32
    return %c0_i32, %c0_i32_0 : i32, i32
  }
  func.func @transform_10(%arg0: i32) -> (i32, i32) {
    %c0_i32 = arith.constant 0 : i32
    %c0_i32_0 = arith.constant 0 : i32
    %c0_i32_1 = arith.constant 0 : i32
    return %c0_i32, %c0_i32_0 : i32, i32
  }
  func.func @transform_11(%arg0: i32) -> (i32, i32) {
    %c0_i32 = arith.constant 0 : i32
    %c0_i32_0 = arith.constant 0 : i32
    %c0_i32_1 = arith.constant 0 : i32
    return %c0_i32, %c0_i32_0 : i32, i32
  }
  func.func @transform_12(%arg0: i32) -> (i32, i32) {
    %c0_i32 = arith.constant 0 : i32
    %c0_i32_0 = arith.constant 0 : i32
    %c0_i32_1 = arith.constant 0 : i32
    return %c0_i32, %c0_i32_0 : i32, i32
  }
}

</mosaic_0001>

<bundles_post_ra>
// kernel: _forward.1
= control target key start
LH: loop header
LB: loop body
LE: loop exit
PB: predicated region body
PF: predicated region fallthrough
CT: control target
= control target key end

     0   :  { %vm126_vm0 = vcmask 293888   ;;  %vm151_vm1 = vcmask 1041408   ;;  %s3448_s0 = inlined_call_operand.vmem [shape: bf16[128,36], index: 0, kind: input, shape index: {}]   ;;  %s3449_s1 = inlined_call_operand.vmem [shape: bf16[36,8], index: 1, kind: input, shape index: {}]   ;;  %s3450_s2 = inlined_call_operand.vmem [shape: f32[1,8], index: 2, kind: input, shape index: {}]   ;;  %s3451_s3 = inlined_call_operand.vmem [shape: f32[1,8], index: 3, kind: input, shape index: {}]   ;;  %s3452_s4 = inlined_call_operand.vmem [shape: f32[1,8], index: 4, kind: input, shape index: {}]   ;;  %s3453_s5 = inlined_call_operand.vmem [shape: bf16[72,16], index: 5, kind: input, shape index: {}]   ;;  %s3454_s6 = inlined_call_operand.vmem [shape: f32[1,16], index: 6, kind: input, shape index: {}]   ;;  %s3455_s7 = inlined_call_operand.vmem [shape: f32[1,16], index: 7, kind: input, shape index: {}]   ;;  %s3456_s8 = inlined_call_operand.vmem [shape: f32[1,16], index: 8, kind: input, shape index: {}]   ;;  %s3457_s9 = inlined_call_operand.vmem [shape: bf16[128,4], index: 9, kind: input, shape index: {}]   ;;  %s3458_s10 = inlined_call_operand.vmem [shape: bf16[4,16], index: 10, kind: input, shape index: {}]   ;;  %s3459_s11 = inlined_call_operand.vmem [shape: f32[1,16], index: 11, kind: input, shape index: {}]   ;;  %s3460_s12 = inlined_call_operand.hbm [shape: f32[128,16], index: 12, kind: output, shape index: {}]  }
   0x1   :  { %v2389_v0 = vld [vmem:[%s3449_s1] sm:$0xff]   ;;  %v2390_v1 = vld [vmem:[%s3449_s1 + $0x8] sm:$0xff]   ;;  %v2391_v2 = vld [vmem:[%s3449_s1 + $0x10] ss:$0 sps:$4 sm:$0x33]  }
   0x2   :  { %1982 = vmatprep.subr.bf16.mxu0 %v2389_v0  ;;  %2048 = vmatprep.subr.bf16.mxu1 %v2389_v0  ;;  %v2392_v3 = vld [vmem:[%s3448_s0] sm:$0xff]   ;;  %v2394_v4 = vld [vmem:[%s3448_s0 + $0x10] sm:$0xff]   ;;  %v153_v5 = vsel %vm151_vm1, %v2391_v2, 0  ;;  %v2393_v6 = vld [vmem:[%s3448_s0 + $0x8] sm:$0xff]  }
   0x3   :  { %1983 = vmatpush3.bf16.msra.mxu0 %v2389_v0  ;;  %2051 = vmatpush3.bf16.msra.mxu1 %v2389_v0  ;;  %v2395_v7 = vld [vmem:[%s3448_s0 + $0x18] sm:$0xff]   ;;  %v2396_v8 = vld [vmem:[%s3448_s0 + $0x20] sm:$0xff]   ;;  %v2397_v9 = vld [vmem:[%s3448_s0 + $0x28] sm:$0xff]  }
   0x4   :  { %1984 = vmatprep.subr.bf16.mxu0 %v2390_v1  ;;  %2049 = vmatprep.subr.bf16.mxu1 %v2390_v1  ;;  %v2398_v10 = vld [vmem:[%s3448_s0 + $0x30] sm:$0xff]  }
   0x5   :  { %1988 = vmatprep.mubr.msk.bf16.mxu0 %vm126_vm0, %v2392_v3  ;;  %1992 = vmatprep.mubr.msk.bf16.mxu1 %vm126_vm0, %v2394_v4 }
   0x7   :  { %1985 = vmatpush3.bf16.msra.mxu0 %v2390_v1  ;;  %2052 = vmatpush3.bf16.msra.mxu1 %v2390_v1 }
   0x8   :  { %2054 = vmatprep.subr.msk.bf16.mxu0 %vm151_vm1, %v2391_v2  ;;  %2055 = vmatprep.subr.msk.bf16.mxu1 %vm151_vm1, %v2391_v2 }
   0xb   :  { %1987 = vmatpush3.bf16.msra.mxu0 %v153_v5  ;;  %2053 = vmatpush3.bf16.msra.mxu1 %v153_v5 }
   0xe   :  { %1989 = vmatmul.mubr.msk.bf16.vlgmr.msra.gmra.mrb[0].mxu0 %vm126_vm0, %v2393_v6  ;;  %1993 = vmatmul.mubr.msk.bf16.vlgmr.msra.gmra.mrb[0].mxu1 %vm126_vm0, %v2395_v7 }
   0xf   :  { %1996 = vmatprep.mubr.msk.bf16.mxu1 %vm126_vm0, %v2396_v8 }
  0x10   :  { %17 = vsyncpa [#allocation4], 0  ;;  %v2399_v11 = vld [vmem:[%s3448_s0 + $0x38] sm:$0xff]   ;;  %v2564_v12 = vld [vmem:[%s3450_s2] ss:$0 sm:$0xff]  ;;  %vm254_vm2 = vcmask 64512  }
  0x11   :  { %vm443_vm3 = vcmask 58368   ;;  %v2441_v28 = vmov 0.0   ;;  %s2443_s27 = smov 8   ;;  %s2444_s28 = smov 24   ;;  %vm1368_vm4 = vcmask 1043456   ;;  %vm1721_vm5 = vcmask 31744  }
  0x12   :  { %467 = vst.msk [vmem:[#allocation2 + $0xc0] sm:$0xff] %vm254_vm2, %v2441_v28  ;;  %469 = vst.msk [vmem:[#allocation2 + $0xd0] sm:$0xff] %vm254_vm2, %v2441_v28  ;;  %s2445_s14 = smov 32   ;;  %s2446_s17 = smov 40   ;;  %vm1173_vm6 = vcmask 130048   ;;  %vm1190_vm7 = vcmask 195584  }
  0x13   :  { %468 = vst.msk [vmem:[#allocation2 + $0xc8] sm:$0x3] %vm443_vm3, %v2441_v28  ;;  %470 = vst.msk [vmem:[#allocation2 + $0xd8] sm:$0x3] %vm443_vm3, %v2441_v28  ;;  %s2447_s20 = smov 48   ;;  %s2448_s23 = smov 56  }
  0x14   :  { %471 = vst.msk [vmem:[#allocation2 + $0xe0] sm:$0xff] %vm254_vm2, %v2441_v28  ;;  %473 = vst.msk [vmem:[#allocation2 + $0xf0] sm:$0xff] %vm254_vm2, %v2441_v28  ;;  %s2449_s24 = smov 64   ;;  %vm1207_vm8 = vcmask 261120   ;;  %vm1224_vm9 = vcmask 326656   ;;  %vm1241_vm10 = vcmask 392192  }
  0x15   :  { %472 = vst.msk [vmem:[#allocation2 + $0xe8] sm:$0x3] %vm443_vm3, %v2441_v28  ;;  %474 = vst.msk [vmem:[#allocation2 + $0xf8] sm:$0x3] %vm443_vm3, %v2441_v28  ;;  %vm1258_vm11 = vcmask 457728   ;;  %vm1275_vm12 = vcmask 523264  }
  0x16   :  { %1997 = vmatmul.mubr.msk.bf16.gmra.mrb[4].mxu1 %vm126_vm0, %v2397_v9  ;;  %475 = vst.msk [vmem:[#allocation2 + $0x100] sm:$0xff] %vm254_vm2, %v2441_v28  ;;  %477 = vst.msk [vmem:[#allocation2 + $0x110] sm:$0xff] %vm254_vm2, %v2441_v28  ;;  %vm1343_vm13 = vcmask 588800  }
  0x17   :  { %2000 = vmatprep.mubr.msk.bf16.mxu1 %vm126_vm0, %v2398_v10  ;;  %476 = vst.msk [vmem:[#allocation2 + $0x108] sm:$0x3] %vm443_vm3, %v2441_v28  ;;  %478 = vst.msk [vmem:[#allocation2 + $0x118] sm:$0x3] %vm443_vm3, %v2441_v28 }
  0x18   :  { %479 = vst.msk [vmem:[#allocation2 + $0x120] sm:$0xff] %vm254_vm2, %v2441_v28  ;;  %442 = vst.msk [vmem:[#allocation2] sm:$0xff] %vm254_vm2, %v2441_v28 }
  0x19   :  { %480 = vst.msk [vmem:[#allocation2 + $0x128] sm:$0x3] %vm443_vm3, %v2441_v28  ;;  %444 = vst.msk [vmem:[#allocation2 + $0x8] sm:$0x3] %vm443_vm3, %v2441_v28 }
  0x1a   :  { %445 = vst.msk [vmem:[#allocation2 + $0x10] sm:$0xff] %vm254_vm2, %v2441_v28  ;;  %447 = vst.msk [vmem:[#allocation2 + $0x20] sm:$0xff] %vm254_vm2, %v2441_v28 }
  0x1b   :  { %446 = vst.msk [vmem:[#allocation2 + $0x18] sm:$0x3] %vm443_vm3, %v2441_v28  ;;  %448 = vst.msk [vmem:[#allocation2 + $0x28] sm:$0x3] %vm443_vm3, %v2441_v28 }
  0x1c   :  { %449 = vst.msk [vmem:[#allocation2 + $0x30] sm:$0xff] %vm254_vm2, %v2441_v28  ;;  %451 = vst.msk [vmem:[#allocation2 + $0x40] sm:$0xff] %vm254_vm2, %v2441_v28 }
  0x1d   :  { %450 = vst.msk [vmem:[#allocation2 + $0x38] sm:$0x3] %vm443_vm3, %v2441_v28  ;;  %452 = vst.msk [vmem:[#allocation2 + $0x48] sm:$0x3] %vm443_vm3, %v2441_v28 }
  0x1e   :  { %2001 = vmatmul.mubr.msk.bf16.gmra.mrb[8].mxu1 %vm126_vm0, %v2399_v11  ;;  %453 = vst.msk [vmem:[#allocation2 + $0x50] sm:$0xff] %vm254_vm2, %v2441_v28  ;;  %455 = vst.msk [vmem:[#allocation2 + $0x60] sm:$0xff] %vm254_vm2, %v2441_v28 }
  0x1f   :  { %454 = vst.msk [vmem:[#allocation2 + $0x58] sm:$0x3] %vm443_vm3, %v2441_v28  ;;  %456 = vst.msk [vmem:[#allocation2 + $0x68] sm:$0x3] %vm443_vm3, %v2441_v28 }
  0x20   :  { %457 = vst.msk [vmem:[#allocation2 + $0x70] sm:$0xff] %vm254_vm2, %v2441_v28  ;;  %459 = vst.msk [vmem:[#allocation2 + $0x80] sm:$0xff] %vm254_vm2, %v2441_v28 }
  0x21   :  { %458 = vst.msk [vmem:[#allocation2 + $0x78] sm:$0x3] %vm443_vm3, %v2441_v28  ;;  %460 = vst.msk [vmem:[#allocation2 + $0x88] sm:$0x3] %vm443_vm3, %v2441_v28 }
  0x22   :  { %461 = vst.msk [vmem:[#allocation2 + $0x90] sm:$0xff] %vm254_vm2, %v2441_v28  ;;  %463 = vst.msk [vmem:[#allocation2 + $0xa0] sm:$0xff] %vm254_vm2, %v2441_v28 }
  0x23   :  { %462 = vst.msk [vmem:[#allocation2 + $0x98] sm:$0x3] %vm443_vm3, %v2441_v28  ;;  %464 = vst.msk [vmem:[#allocation2 + $0xa8] sm:$0x3] %vm443_vm3, %v2441_v28 }
  0x24   :  { %465 = vst.msk [vmem:[#allocation2 + $0xb0] sm:$0xff] %vm254_vm2, %v2441_v28  ;;  %481 = vst.msk [vmem:[#allocation2 + $0x130] sm:$0xff] %vm254_vm2, %v2441_v28 }
  0x25   :  { %466 = vst.msk [vmem:[#allocation2 + $0xb8] sm:$0x3] %vm443_vm3, %v2441_v28  ;;  %482 = vst.msk [vmem:[#allocation2 + $0x138] sm:$0x3] %vm443_vm3, %v2441_v28 }
  0xe1   :  { %v1990_v13 = vpop.f32.mrb[0].mxu0  ;;  %v2566_v14 = vpop.f32.mrb[0].mxu1 }
  0xe2   :  { %v189_v15 = vpop.f32.mrb[1].mxu0  ;;  %v205_v16 = vpop.f32.mrb[1].mxu1  ;;  %v2574_v22 = vadd.f32 %v1990_v13, %v2564_v12  ;;  %v214_v40 = vadd.f32 %v2566_v14, %v2564_v12 }
  0xe3   :  { %v2569_v17 = vadd.f32 %v2564_v12, %v189_v15  ;;  %v1991_v18 = vpop.f32.mrb[2].mxu0  ;;  %v2571_v19 = vpop.f32.mrb[2].mxu1  ;;  %v2587_v27 = vadd.f32 %v2564_v12, %v205_v16 }
  0xe4   :  { %v192_v20 = vpop.f32.mrb[3].mxu0  ;;  %v208_v21 = vpop.f32.mrb[3].mxu1  ;;  %v2582_v25 = vadd.f32 %v1991_v18, %v2564_v12  ;;  %v258_v30 = vsel %vm254_vm2, %v2574_v22, 0.0  ;;  %v217_v42 = vadd.f32 %v2571_v19, %v2564_v12  ;;  %v266_v46 = vsel %vm254_vm2, %v214_v40, 0.0 }
  0xe5   :  { %v2577_v23 = vadd.f32 %v2564_v12, %v192_v20  ;;  %v255_v24 = vsel %vm254_vm2, %v2569_v17, 0.0  ;;  %v262_v35 = vsel %vm254_vm2, %v2587_v27, 0.0  ;;  %v209_v36 = vadd.f32 %v2564_v12, %v208_v21 }
  0xe6   :  { %v260_v34 = vsel %vm254_vm2, %v2582_v25, 0.0  ;;  %v268_v50 = vsel %vm254_vm2, %v217_v42, 0.0 }
  0xe7   :  { %v256_v26 = vsel %vm254_vm2, %v2577_v23, 0.0  ;;  %v264_v43 = vsel %vm254_vm2, %v209_v36, 0.0 }
  0xe8   :  { %v257_v29 = vadd.f32 %v256_v26, %v255_v24 }
  0xe9   :  { %v1998_v31 = vpop.f32.mrb[4].mxu1 }
  0xea   :  { %v259_v32 = vadd.f32 %v258_v30, %v257_v29  ;;  %v221_v33 = vpop.f32.mrb[5].mxu1  ;;  %v230_v56 = vadd.f32 %v1998_v31, %v2564_v12 }
  0xeb   :  { %v1999_v37 = vpop.f32.mrb[6].mxu1  ;;  %v222_v44 = vadd.f32 %v2564_v12, %v221_v33 }
  0xec   :  { %v261_v38 = vadd.f32 %v260_v34, %v259_v32  ;;  %v224_v39 = vpop.f32.mrb[7].mxu1  ;;  %v233_v58 = vadd.f32 %v1999_v37, %v2564_v12  ;;  %v274_v62 = vsel %vm254_vm2, %v230_v56, 0.0 }
  0xed   :  { %v270_v51 = vsel %vm254_vm2, %v222_v44, 0.0  ;;  %v225_v52 = vadd.f32 %v2564_v12, %v224_v39 }
  0xee   :  { %v263_v41 = vadd.f32 %v262_v35, %v261_v38  ;;  %v276_v0 = vsel %vm254_vm2, %v233_v58, 0.0 }
  0xef   :  { %v272_v59 = vsel %vm254_vm2, %v225_v52, 0.0 }
  0xf0   :  { %v265_v45 = vadd.f32 %v264_v43, %v263_v41 }
  0xf1   :  { %v2002_v47 = vpop.f32.mrb[8].mxu1 }
  0xf2   :  { %v267_v48 = vadd.f32 %v266_v46, %v265_v45  ;;  %v237_v49 = vpop.f32.mrb[9].mxu1  ;;  %v246_v4 = vadd.f32 %v2002_v47, %v2564_v12 }
  0xf3   :  { %v2003_v53 = vpop.f32.mrb[10].mxu1  ;;  %v238_v60 = vadd.f32 %v2564_v12, %v237_v49 }
  0xf4   :  { %v269_v54 = vadd.f32 %v268_v50, %v267_v48  ;;  %v240_v55 = vpop.f32.mrb[11].mxu1  ;;  %v249_v6 = vadd.f32 %v2003_v53, %v2564_v12  ;;  %v282_v9 = vsel %vm254_vm2, %v246_v4, 0.0 }
  0xf5   :  { %v278_v1 = vsel %vm254_vm2, %v238_v60, 0.0  ;;  %v241_v2 = vadd.f32 %v2564_v12, %v240_v55 }
  0xf6   :  { %v271_v57 = vadd.f32 %v270_v51, %v269_v54  ;;  %v284_v11 = vsel %vm254_vm2, %v249_v6, 0.0 }
  0xf7   :  { %v280_v7 = vsel %vm254_vm2, %v241_v2, 0.0 }
  0xf8   :  { %v273_v61 = vadd.f32 %v272_v59, %v271_v57 }
  0xfa   :  { %v275_v63 = vadd.f32 %v274_v62, %v273_v61 }
  0xfc   :  { %v277_v3 = vadd.f32 %v276_v0, %v275_v63 }
  0xfe   :  { %v279_v5 = vadd.f32 %v278_v1, %v277_v3 }
 0x100   :  { %v281_v8 = vadd.f32 %v280_v7, %v279_v5 }
 0x102   :  { %v283_v10 = vadd.f32 %v282_v9, %v281_v8 }
 0x104   :  { %v285_v13 = vadd.f32 %v284_v11, %v283_v10 }
 0x106   :  { %v286_v14 = vrot.slane %v285_v13, 4 }
 0x108   :  { %v287_v15 = vadd.f32 %v286_v14, %v285_v13 }
 0x10a   :  { %v288_v16 = vrot.slane %v287_v15, 2 }
 0x10c   :  { %v289_v18 = vadd.f32 %v288_v16, %v287_v15 }
 0x10e   :  { %v290_v19 = vrot.slane %v289_v18, 1 }
 0x110   :  { %v291_v20 = vadd.f32 %v290_v19, %v289_v18 }
 0x112   :  { %v293_v21 = vmul.f32 0.0078125, %v291_v20 }
 0x114   :  { %v2660_v24 = vsub.f32 %v2569_v17, %v293_v21  ;;  %v2663_v12 = vsub.f32 %v2577_v23, %v293_v21  ;;  %v2666_v26 = vsub.f32 %v2574_v22, %v293_v21  ;;  %v2669_v28 = vsub.f32 %v2582_v25, %v293_v21 }
 0x115   :  { %v2672_v29 = vsub.f32 %v2587_v27, %v293_v21  ;;  %v2674_v30 = vsub.f32 %v209_v36, %v293_v21  ;;  %v2676_v31 = vsub.f32 %v214_v40, %v293_v21  ;;  %v2678_v32 = vsub.f32 %v217_v42, %v293_v21 }
 0x116   :  { %v2680_v17 = vsub.f32 %v222_v44, %v293_v21  ;;  %v2682_v33 = vsub.f32 %v225_v52, %v293_v21  ;;  %v2684_v23 = vsub.f32 %v230_v56, %v293_v21  ;;  %v2686_v22 = vsub.f32 %v233_v58, %v293_v21 }
 0x117   :  { %v2688_v34 = vsub.f32 %v238_v60, %v293_v21  ;;  %v2690_v25 = vsub.f32 %v241_v2, %v293_v21  ;;  %v2692_v27 = vsub.f32 %v246_v4, %v293_v21  ;;  %v2694_v35 = vsub.f32 %v249_v6, %v293_v21 }
 0x118   :  { %v310_v36 = vmul.f32 %v2660_v24, %v2660_v24  ;;  %v311_v37 = vmul.f32 %v2663_v12, %v2663_v12  ;;  %v312_v38 = vmul.f32 %v2666_v26, %v2666_v26  ;;  %v313_v39 = vmul.f32 %v2669_v28, %v2669_v28 }
 0x119   :  { %v314_v43 = vmul.f32 %v2672_v29, %v2672_v29  ;;  %v315_v46 = vmul.f32 %v2674_v30, %v2674_v30  ;;  %v316_v49 = vmul.f32 %v2676_v31, %v2676_v31  ;;  %v317_v52 = vmul.f32 %v2678_v32, %v2678_v32 }
 0x11a   :  { %v326_v40 = vsel %vm254_vm2, %v310_v36, 0.0  ;;  %v327_v41 = vsel %vm254_vm2, %v311_v37, 0.0  ;;  %v329_v44 = vsel %vm254_vm2, %v312_v38, 0.0  ;;  %v331_v47 = vsel %vm254_vm2, %v313_v39, 0.0 }
 0x11b   :  { %v328_v42 = vadd.f32 %v327_v41, %v326_v40  ;;  %v333_v50 = vsel %vm254_vm2, %v314_v43, 0.0  ;;  %v335_v53 = vsel %vm254_vm2, %v315_v46, 0.0  ;;  %v318_v55 = vmul.f32 %v2680_v17, %v2680_v17 }
 0x11c   :  { %v337_v56 = vsel %vm254_vm2, %v316_v49, 0.0  ;;  %v319_v58 = vmul.f32 %v2682_v33, %v2682_v33  ;;  %v339_v59 = vsel %vm254_vm2, %v317_v52, 0.0  ;;  %v320_v61 = vmul.f32 %v2684_v23, %v2684_v23 }
 0x11d   :  { %v330_v45 = vadd.f32 %v329_v44, %v328_v42  ;;  %v341_v62 = vsel %vm254_vm2, %v318_v55, 0.0  ;;  %v321_v0 = vmul.f32 %v2686_v22, %v2686_v22  ;;  %v322_v3 = vmul.f32 %v2688_v34, %v2688_v34 }
 0x11e   :  { %v343_v1 = vsel %vm254_vm2, %v319_v58, 0.0  ;;  %v345_v4 = vsel %vm254_vm2, %v320_v61, 0.0  ;;  %v323_v6 = vmul.f32 %v2690_v25, %v2690_v25  ;;  %v324_v9 = vmul.f32 %v2692_v27, %v2692_v27 }
 0x11f   :  { %v332_v48 = vadd.f32 %v331_v47, %v330_v45  ;;  %v347_v7 = vsel %vm254_vm2, %v321_v0, 0.0  ;;  %v349_v10 = vsel %vm254_vm2, %v322_v3, 0.0  ;;  %v325_v13 = vmul.f32 %v2694_v35, %v2694_v35 }
 0x120   :  { %v351_v14 = vsel %vm254_vm2, %v323_v6, 0.0  ;;  %v353_v16 = vsel %vm254_vm2, %v324_v9, 0.0 }
 0x121   :  { %v334_v51 = vadd.f32 %v333_v50, %v332_v48  ;;  %v355_v19 = vsel %vm254_vm2, %v325_v13, 0.0  ;;  %v1914_v48 = vld [vmem:[%s3451_s3] ss:$0 sm:$0xff] }
 0x123   :  { %v336_v54 = vadd.f32 %v335_v53, %v334_v51 }
 0x125   :  { %v338_v57 = vadd.f32 %v337_v56, %v336_v54 }
 0x127   :  { %v340_v60 = vadd.f32 %v339_v59, %v338_v57 }
 0x129   :  { %v342_v63 = vadd.f32 %v341_v62, %v340_v60 }
 0x12b   :  { %v344_v2 = vadd.f32 %v343_v1, %v342_v63 }
 0x12d   :  { %v346_v5 = vadd.f32 %v345_v4, %v344_v2 }
 0x12f   :  { %v348_v8 = vadd.f32 %v347_v7, %v346_v5 }
 0x131   :  { %v350_v11 = vadd.f32 %v349_v10, %v348_v8 }
 0x133   :  { %v352_v15 = vadd.f32 %v351_v14, %v350_v11 }
 0x135   :  { %v354_v18 = vadd.f32 %v353_v16, %v352_v15 }
 0x137   :  { %v356_v20 = vadd.f32 %v355_v19, %v354_v18 }
 0x139   :  { %v357_v21 = vrot.slane %v356_v20, 4 }
 0x13b   :  { %v358_v36 = vadd.f32 %v357_v21, %v356_v20 }
 0x13d   :  { %v359_v37 = vrot.slane %v358_v36, 2 }
 0x13f   :  { %v360_v38 = vadd.f32 %v359_v37, %v358_v36 }
 0x141   :  { %v361_v39 = vrot.slane %v360_v38, 1 }
 0x143   :  { %v362_v40 = vadd.f32 %v361_v39, %v360_v38 }
 0x145   :  { %v363_v41 = vmul.f32 0.0078125, %v362_v40 }
 0x147   :  { %v364_v42 = vadd.f32 1e-05, %v363_v41 }
 0x149   :  { %2413 = vrsqrt.f32 %v364_v42 }
 0x153   :  { %v2414_v43 = vpop.eup %2413 }
 0x154   :  { %v366_v44 = vmul.f32 %v2414_v43, %v2660_v24  ;;  %v367_v45 = vmul.f32 %v2414_v43, %v2663_v12  ;;  %v368_v46 = vmul.f32 %v2414_v43, %v2666_v26  ;;  %v369_v47 = vmul.f32 %v2414_v43, %v2669_v28 }
 0x155   :  { %v370_v49 = vmul.f32 %v2414_v43, %v2672_v29  ;;  %v371_v50 = vmul.f32 %v2414_v43, %v2674_v30  ;;  %v372_v51 = vmul.f32 %v2414_v43, %v2676_v31  ;;  %v373_v52 = vmul.f32 %v2414_v43, %v2678_v32 }
 0x156   :  { %v374_v24 = vmul.f32 %v2414_v43, %v2680_v17  ;;  %v375_v12 = vmul.f32 %v2414_v43, %v2682_v33  ;;  %v376_v26 = vmul.f32 %v2414_v43, %v2684_v23  ;;  %v377_v28 = vmul.f32 %v2414_v43, %v2686_v22  ;;  %v1915_v17 = vld [vmem:[%s3452_s4] ss:$0 sm:$0xff]  ;;  %s2442_s4 = smov 16  }
 0x157   :  { %v378_v53 = vmul.f32 %v2414_v43, %v2688_v34  ;;  %v379_v54 = vmul.f32 %v2414_v43, %v2690_v25  ;;  %v380_v29 = vmul.f32 %v2414_v43, %v2692_v27  ;;  %v381_v30 = vmul.f32 %v2414_v43, %v2694_v35 }
 0x158   :  { %v388_v55 = vmul.f32 %v1914_v48, %v366_v44  ;;  %v389_v31 = vmul.f32 %v1914_v48, %v367_v45  ;;  %v390_v56 = vmul.f32 %v1914_v48, %v368_v46  ;;  %v391_v32 = vmul.f32 %v1914_v48, %v369_v47  ;;  %v532_v46 = vld [vmem:[#allocation2 + $0x2] sm:$0xff] }
 0x159   :  { %v392_v33 = vmul.f32 %v1914_v48, %v370_v49  ;;  %v393_v23 = vmul.f32 %v1914_v48, %v371_v50  ;;  %v394_v57 = vmul.f32 %v1914_v48, %v372_v51  ;;  %v395_v22 = vmul.f32 %v1914_v48, %v373_v52  ;;  %v516_v47 = vld [vmem:[#allocation2 + $0x1] sm:$0xff] }
 0x15a   :  { %v396_v58 = vmul.f32 %v1914_v48, %v374_v24  ;;  %v397_v34 = vmul.f32 %v1914_v48, %v375_v12  ;;  %v398_v59 = vmul.f32 %v1914_v48, %v376_v26  ;;  %v399_v25 = vmul.f32 %v1914_v48, %v377_v28 }
 0x15b   :  { %v400_v60 = vmul.f32 %v1914_v48, %v378_v53  ;;  %v401_v27 = vmul.f32 %v1914_v48, %v379_v54  ;;  %v402_v61 = vmul.f32 %v1914_v48, %v380_v29  ;;  %v403_v35 = vmul.f32 %v1914_v48, %v381_v30 }
 0x15c   :  { %v410_v62 = vadd.f32 %v1915_v17, %v388_v55  ;;  %v411_v63 = vadd.f32 %v1915_v17, %v389_v31  ;;  %v412_v0 = vadd.f32 %v1915_v17, %v390_v56  ;;  %v413_v1 = vadd.f32 %v1915_v17, %v391_v32 }
 0x15d   :  { %v414_v2 = vadd.f32 %v1915_v17, %v392_v33  ;;  %v415_v3 = vadd.f32 %v1915_v17, %v393_v23  ;;  %v416_v4 = vadd.f32 %v1915_v17, %v394_v57  ;;  %v417_v5 = vadd.f32 %v1915_v17, %v395_v22  ;;  %v2400_v23 = vld [vmem:[%s3453_s5] sm:$0xff]   ;;  %v2401_v22 = vld [vmem:[%s3453_s5 + $0x8] sm:$0xff]  }
 0x15e   :  { %v418_v6 = vadd.f32 %v1915_v17, %v396_v58  ;;  %v419_v7 = vadd.f32 %v1915_v17, %v397_v34  ;;  %v420_v8 = vadd.f32 %v1915_v17, %v398_v59  ;;  %v421_v9 = vadd.f32 %v1915_v17, %v399_v25  ;;  %2004 = vmatprep.subr.bf16.mxu1 %v2400_v23  ;;  %v2402_v25 = vld [vmem:[%s3453_s5 + $0x10] sm:$0xff]  }
 0x15f   :  { %v422_v10 = vadd.f32 %v1915_v17, %v400_v60  ;;  %v423_v11 = vadd.f32 %v1915_v17, %v401_v27  ;;  %v424_v13 = vadd.f32 %v1915_v17, %v402_v61  ;;  %v425_v14 = vadd.f32 %v1915_v17, %v403_v35  ;;  %2005 = vmatpush3.bf16.msra.mxu1 %v2400_v23  ;;  %v2403_v35 = vld [vmem:[%s3453_s5 + $0x18] sm:$0xff]  }
 0x160   :  { %v427_v15 = vmax.f32 %v411_v63, 0.0  ;;  %v428_v16 = vmax.f32 %v412_v0, 0.0  ;;  %v429_v18 = vmax.f32 %v413_v1, 0.0  ;;  %v430_v19 = vmax.f32 %v414_v2, 0.0  ;;  %2006 = vmatprep.subr.bf16.mxu1 %v2401_v22  ;;  %v2404_v63 = vld [vmem:[%s3453_s5 + $0x20] ss:$0 sps:$4 sm:$0xff]  }
 0x161   :  { %v431_v20 = vmax.f32 %v415_v3, 0.0  ;;  %v432_v21 = vmax.f32 %v416_v4, 0.0  ;;  %v433_v36 = vmax.f32 %v417_v5, 0.0  ;;  %v434_v37 = vmax.f32 %v418_v6, 0.0 }
 0x162   :  { %v435_v38 = vmax.f32 %v419_v7, 0.0  ;;  %v436_v39 = vmax.f32 %v420_v8, 0.0  ;;  %v437_v40 = vmax.f32 %v421_v9, 0.0  ;;  %v438_v41 = vmax.f32 %v422_v10, 0.0  ;;  %485 = vst.msk [vmem:[#allocation2 + $0x21] sm:$0xff] %vm254_vm2, %v427_v15  ;;  %486 = vst.msk [vmem:[#allocation2 + $0x31] sm:$0xff] %vm254_vm2, %v428_v16 }
 0x163   :  { %487 = vst.msk [vmem:[#allocation2 + $0x41] sm:$0xff] %vm254_vm2, %v429_v18  ;;  %488 = vst.msk [vmem:[#allocation2 + $0x51] sm:$0xff] %vm254_vm2, %v430_v19  ;;  %v439_v42 = vmax.f32 %v423_v11, 0.0  ;;  %v440_v43 = vmax.f32 %v424_v13, 0.0  ;;  %v441_v44 = vmax.f32 %v425_v14, 0.0  ;;  %v426_v45 = vmax.f32 %v410_v62, 0.0  ;;  %2007 = vmatpush3.bf16.msra.mxu1 %v2401_v22 }
 0x164   :  { %489 = vst.msk [vmem:[#allocation2 + $0x61] sm:$0xff] %vm254_vm2, %v431_v20  ;;  %490 = vst.msk [vmem:[#allocation2 + $0x71] sm:$0xff] %vm254_vm2, %v432_v21  ;;  %2008 = vmatprep.subr.bf16.mxu1 %v2402_v25  ;;  %v1370_v3 = vsel %vm1368_vm4, %v2404_v63, 0 }
 0x165   :  { %491 = vst.msk [vmem:[#allocation2 + $0x81] sm:$0xff] %vm254_vm2, %v433_v36  ;;  %492 = vst.msk [vmem:[#allocation2 + $0xb1] sm:$0xff] %vm254_vm2, %v434_v37  ;;  %v604_v36 = vld [vmem:[#allocation2 + $0x90] sm:$0xff] }
 0x166   :  { %493 = vst.msk [vmem:[#allocation2 + $0xc1] sm:$0xff] %vm254_vm2, %v435_v38  ;;  %494 = vst.msk [vmem:[#allocation2 + $0xd1] sm:$0xff] %vm254_vm2, %v436_v39  ;;  %v620_v39 = vld [vmem:[#allocation2 + $0x91] sm:$0xff] }
 0x167   :  { %495 = vst.msk [vmem:[#allocation2 + $0xe1] sm:$0xff] %vm254_vm2, %v437_v40  ;;  %496 = vst.msk [vmem:[#allocation2 + $0xf1] sm:$0xff] %vm254_vm2, %v438_v41  ;;  %2009 = vmatpush3.bf16.msra.mxu1 %v2402_v25  ;;  %v524_v41 = vld [vmem:[#allocation2 + $0xa1] sm:$0xff] }
 0x168   :  { %497 = vst.msk [vmem:[#allocation2 + $0x101] sm:$0xff] %vm254_vm2, %v439_v42  ;;  %498 = vst.msk [vmem:[#allocation2 + $0x111] sm:$0xff] %vm254_vm2, %v440_v43  ;;  %2010 = vmatprep.subr.bf16.mxu1 %v2403_v35 }
 0x169   :  { %499 = vst.msk [vmem:[#allocation2 + $0x121] sm:$0xff] %vm254_vm2, %v441_v44  ;;  %484 = vst.msk [vmem:[#allocation2 + $0x11] sm:$0xff] %vm254_vm2, %v426_v45  ;;  %v534_v52 = vld [vmem:[#allocation2 + $0x22] sm:$0xff]  ;;  %v535_v24 = vld [vmem:[#allocation2 + $0x32] sm:$0xff] }
 0x16a   :  { %v518_v12 = vld [vmem:[#allocation2 + $0x21] sm:$0xff]  ;;  %v519_v26 = vld [vmem:[#allocation2 + $0x31] sm:$0xff]  ;;  %v2084_v28 = vpack.i.bf16 %v535_v24, %v534_v52 }
 0x16b   :  { %v2074_v53 = vpack.i.bf16 %v519_v26, %v518_v12  ;;  %v2784_v54 = vld [vmem:[#allocation2 + $0x30] sm:$0xff]  ;;  %v2786_v29 = vld [vmem:[#allocation2 + $0x40] sm:$0xff]  ;;  %2011 = vmatpush3.bf16.msra.mxu1 %v2403_v35 }
 0x16c   :  { %v2790_v55 = vld [vmem:[#allocation2 + $0x20] sm:$0xff]  ;;  %v2094_v31 = vpack.i.bf16 %v2786_v29, %v2784_v54  ;;  %v2808_v59 = vld [vmem:[#allocation2 + $0x50] sm:$0xff]  ;;  %2056 = vmatprep.subr.msk.bf16.mxu1 %vm1368_vm4, %v2404_v63 }
 0x16d   :  { %v567_v32 = vld [vmem:[#allocation2 + $0x41] sm:$0xff]  ;;  %v2124_v60 = vpack.i.bf16 %v2808_v59, %v2786_v29  ;;  %v2119_v27 = vpack.i.bf16 %v2784_v54, %v2790_v55  ;;  %v616_v61 = vld [vmem:[#allocation2 + $0x51] sm:$0xff] }
 0x16e   :  { %v2104_v17 = vpack.i.bf16 %v567_v32, %v519_v26  ;;  %v583_v57 = vld [vmem:[#allocation2 + $0x42] sm:$0xff]  ;;  %v2134_v62 = vpack.i.bf16 %v616_v61, %v567_v32  ;;  %v523_v1 = vld [vmem:[#allocation2 + $0x71] sm:$0xff] }
 0x16f   :  { %v2114_v58 = vpack.i.bf16 %v583_v57, %v535_v24  ;;  %v522_v0 = vld [vmem:[#allocation2 + $0x61] sm:$0xff]  ;;  %v632_v2 = vld [vmem:[#allocation2 + $0x52] sm:$0xff]  ;;  %2013 = vmatpush3.bf16.msra.mxu1 %v1370_v3 }
 0x170   :  { %v533_v48 = vld [vmem:[#allocation2 + $0x12] sm:$0xff]  ;;  %v2154_v4 = vpack.i.bf16 %v523_v1, %v522_v0  ;;  %v2149_v5 = vpack.i.bf16 %v632_v2, %v583_v57  ;;  %v538_v6 = vld [vmem:[#allocation2 + $0x62] sm:$0xff]  ;;  %v2179_v18 = vpack.i.bf16 %v522_v0, %v616_v61 }
 0x171   :  { %v517_v49 = vld [vmem:[#allocation2 + $0x11] sm:$0xff]  ;;  %v2079_v50 = vpack.i.bf16 %v533_v48, %v532_v46  ;;  %v2109_v34 = vpack.i.bf16 %v534_v52, %v533_v48  ;;  %v555_v10 = vld [vmem:[#allocation2 + $0x80] sm:$0xff]  ;;  %v2189_v21 = vpack.i.bf16 %v538_v6, %v632_v2 }
 0x172   :  { %v2069_v51 = vpack.i.bf16 %v517_v49, %v516_v47  ;;  %v2788_v30 = vld [vmem:[#allocation2 + $0x10] sm:$0xff]  ;;  %v2099_v33 = vpack.i.bf16 %v518_v12, %v517_v49  ;;  %v2835_v11 = vld [vmem:[#allocation2 + $0x60] sm:$0xff]  ;;  %v2204_v37 = vpack.i.bf16 %v604_v36, %v555_v10 }
 0x173   :  { %2080 = vrot.lane.b32.xlu1 %v2079_v50, %s2442_s4  ;;  %v2089_v56 = vpack.i.bf16 %v2790_v55, %v2788_v30  ;;  %v539_v7 = vld [vmem:[#allocation2 + $0x72] sm:$0xff]  ;;  %v2169_v14 = vpack.i.bf16 %v2835_v11, %v2808_v59  ;;  %v571_v15 = vld [vmem:[#allocation2 + $0x81] sm:$0xff] }
 0x174   :  { %2070 = vrot.lane.b32.xlu0 %v2069_v51, %s2443_s27  ;;  %v2164_v8 = vpack.i.bf16 %v539_v7, %v538_v6  ;;  %v2833_v9 = vld [vmem:[#allocation2 + $0x70] sm:$0xff]  ;;  %v2184_v16 = vpack.i.bf16 %v571_v15, %v523_v1  ;;  %v587_v19 = vld [vmem:[#allocation2 + $0x82] sm:$0xff]  ;;  %v2214_v40 = vpack.i.bf16 %v620_v39, %v571_v15 }
 0x175   :  { %v2174_v13 = vpack.i.bf16 %v555_v10, %v2833_v9  ;;  %v2194_v20 = vpack.i.bf16 %v587_v19, %v539_v7  ;;  %v2199_v38 = vpack.i.bf16 %v2833_v9, %v2835_v11  ;;  %v525_v42 = vld [vmem:[#allocation2 + $0xb1] sm:$0xff]  ;;  %v526_v44 = vld [vmem:[#allocation2 + $0xc1] sm:$0xff] }
 0x176   :  { %v2224_v43 = vpack.i.bf16 %v525_v42, %v524_v41  ;;  %v527_v45 = vld [vmem:[#allocation2 + $0xd1] sm:$0xff]  ;;  %v540_v49 = vld [vmem:[#allocation2 + $0xa2] sm:$0xff]  ;;  %v2259_v23 = vpack.i.bf16 %v526_v44, %v525_v42 }
 0x177   :  { %2085 = vrot.lane.b32.xlu1 %v2084_v28, %s2442_s4  ;;  %v636_v46 = vld [vmem:[#allocation2 + $0x92] sm:$0xff]  ;;  %v2234_v47 = vpack.i.bf16 %v527_v45, %v526_v44  ;;  %v542_v50 = vld [vmem:[#allocation2 + $0xc2] sm:$0xff] }
 0x178   :  { %2075 = vrot.lane.b32.xlu0 %v2074_v53, %s2443_s27  ;;  %v2229_v48 = vpack.i.bf16 %v636_v46, %v587_v19  ;;  %v543_v51 = vld [vmem:[#allocation2 + $0xd2] sm:$0xff]  ;;  %v591_v57 = vld [vmem:[#allocation2 + $0xe2] sm:$0xff] }
 0x179   :  { %v541_v52 = vld [vmem:[#allocation2 + $0xb2] sm:$0xff]  ;;  %v2244_v24 = vpack.i.bf16 %v543_v51, %v542_v50  ;;  %v2274_v22 = vpack.i.bf16 %v591_v57, %v543_v51  ;;  %v530_v35 = vld [vmem:[#allocation2 + $0x101] sm:$0xff] }
 0x17a   :  { %v2239_v12 = vpack.i.bf16 %v541_v52, %v540_v49  ;;  %v2858_v26 = vld [vmem:[#allocation2 + $0xd0] sm:$0xff]  ;;  %v546_v2 = vld [vmem:[#allocation2 + $0x102] sm:$0xff]  ;;  %v2406_v46 = vld [vmem:[%s3457_s9 + $0x8] sm:$0xff]  }
 0x17b   :  { %2095 = vrot.lane.b32.xlu1 %v2094_v31, %s2444_s28  ;;  %v2864_v31 = vld [vmem:[#allocation2 + $0xc0] sm:$0xff]  ;;  %v640_v63 = vld [vmem:[#allocation2 + $0xf2] sm:$0xff] }
 0x17c   :  { %2090 = vrot.lane.b32.xlu0 %v2089_v56, %s2444_s28  ;;  %v2309_v1 = vpack.i.bf16 %v640_v63, %v591_v57  ;;  %v547_v3 = vld [vmem:[#allocation2 + $0x112] sm:$0xff]  ;;  %v563_v6 = vld [vmem:[#allocation2 + $0x120] sm:$0xff]  ;;  %v2349_v19 = vpack.i.bf16 %v546_v2, %v640_v63 }
 0x17d   :  { %v2894_v7 = vld [vmem:[#allocation2 + $0x100] sm:$0xff]  ;;  %v628_v39 = vld [vmem:[#allocation2 + $0x131] sm:$0xff] }
 0x17e   :  { %v2405_v41 = vld [vmem:[%s3457_s9] sm:$0xff]  }
 0x17f   :  { %2105 = vrot.lane.b32.xlu1 %v2104_v17, %s2445_s14  ;;  %v575_v17 = vld [vmem:[#allocation2 + $0xe1] sm:$0xff]  ;;  %2032 = vmatprep.mubr.msk.bf16.mxu0 %vm1721_vm5, %v2405_v41 }
 0x180   :  { %2100 = vrot.lane.b32.xlu0 %v2099_v33, %s2445_s14  ;;  %v2264_v33 = vpack.i.bf16 %v575_v17, %v527_v45 }
 0x183   :  { %2115 = vrot.lane.b32.xlu1 %v2114_v58, %s2446_s17  ;;  %v2269_v58 = vpack.i.bf16 %v542_v50, %v541_v52 }
 0x184   :  { %2110 = vrot.lane.b32.xlu0 %v2109_v34, %s2446_s17  ;;  %v2876_v34 = vld [vmem:[#allocation2 + $0xf0] sm:$0xff] }
 0x185   :  { %v2329_v10 = vpack.i.bf16 %v2894_v7, %v2876_v34 }
 0x187   :  { %2125 = vrot.lane.b32.xlu1 %v2124_v60, %s2447_s20  ;;  %v2279_v60 = vpack.i.bf16 %v2858_v26, %v2864_v31 }
 0x188   :  { %2120 = vrot.lane.b32.xlu0 %v2119_v27, %s2447_s20  ;;  %v624_v27 = vld [vmem:[#allocation2 + $0xf1] sm:$0xff] }
 0x189   :  { %v2294_v61 = vpack.i.bf16 %v624_v27, %v575_v17  ;;  %v2339_v15 = vpack.i.bf16 %v530_v35, %v624_v27 }
 0x18b   :  { %2135 = vrot.lane.b32.xlu1 %v2134_v62, %s2448_s23 }
 0x18c   :  { %2130 = vrot.lane.b32.xlu0 %v2074_v53, %s2448_s23  ;;  %v2862_v53 = vld [vmem:[#allocation2 + $0xb0] sm:$0xff] }
 0x18d   :  { %v2249_v32 = vpack.i.bf16 %v2864_v31, %v2862_v53 }
 0x18f   :  { %2145 = vrot.lane.b32.xlu1 %v2134_v62, %s2443_s27  ;;  %v531_v62 = vld [vmem:[#allocation2 + $0x111] sm:$0xff] }
 0x190   :  { %2140 = vrot.lane.b32.xlu0 %v2084_v28, %s2449_s24  ;;  %v2860_v28 = vld [vmem:[#allocation2 + $0xe0] sm:$0xff]  ;;  %v2314_v0 = vpack.i.bf16 %v531_v62, %v530_v35 }
 0x191   :  { %v2254_v56 = vpack.i.bf16 %v2860_v28, %v2858_v26  ;;  %v2284_v25 = vpack.i.bf16 %v2876_v34, %v2860_v28 }
 0x193   :  { %2155 = vrot.lane.b32.xlu1 %v2154_v4, %s2443_s27 }
 0x194   :  { %2150 = vrot.lane.b32.xlu0 %v2149_v5, %s2449_s24 }
 0x197   :  { %2165 = vrot.lane.b32.xlu1 %v2164_v8, %s2442_s4 }
 0x198   :  { %2160 = vrot.lane.b32.xlu0 %v2149_v5, %s2442_s4  ;;  %v2892_v5 = vld [vmem:[#allocation2 + $0x110] sm:$0xff] }
 0x19b   :  { %2175 = vrot.lane.b32.xlu1 %v2174_v13, %s2444_s28  ;;  %v579_v13 = vld [vmem:[#allocation2 + $0x121] sm:$0xff] }
 0x19c   :  { %2170 = vrot.lane.b32.xlu0 %v2169_v14, %s2444_s28  ;;  %v2344_v14 = vpack.i.bf16 %v579_v13, %v531_v62  ;;  %v2374_v44 = vpack.i.bf16 %v628_v39, %v579_v13 }
 0x19f   :  { %2185 = vrot.lane.b32.xlu1 %v2184_v16, %s2445_s14  ;;  %v595_v16 = vld [vmem:[#allocation2 + $0x122] sm:$0xff] }
 0x1a0   :  { %2180 = vrot.lane.b32.xlu0 %v2179_v18, %s2445_s14  ;;  %v2354_v18 = vpack.i.bf16 %v595_v16, %v547_v3 }
 0x1a3   :  { %2195 = vrot.lane.b32.xlu1 %v2194_v20, %s2446_s17  ;;  %v612_v20 = vld [vmem:[#allocation2 + $0x130] sm:$0xff] }
 0x1a4   :  { %2190 = vrot.lane.b32.xlu0 %v2189_v21, %s2446_s17 }
 0x1a7   :  { %2205 = vrot.lane.b32.xlu1 %v2204_v37, %s2447_s20  ;;  %v2364_v37 = vpack.i.bf16 %v612_v20, %v563_v6 }
 0x1a8   :  { %2200 = vrot.lane.b32.xlu0 %v2199_v38, %s2447_s20  ;;  %v2359_v38 = vpack.i.bf16 %v2892_v5, %v2894_v7 }
 0x1ab   :  { %2215 = vrot.lane.b32.xlu1 %v2214_v40, %s2448_s23  ;;  %v1673_v40 = vld [vmem:[%s3458_s10] sm:$0x3] }
 0x1ac   :  { %2210 = vrot.lane.b32.xlu0 %v2154_v4, %s2448_s23  ;;  %v2324_v4 = vpack.i.bf16 %v547_v3, %v546_v2  ;;  %2057 = vmatprep.subr.msk.bf16.mxu0 %vm151_vm1, %v1673_v40  ;;  %v1747_v45 = vsel %vm151_vm1, %v1673_v40, 0 }
 0x1ad   :  { %2031 = vmatpush3.bf16.msra.mxu0 %v1747_v45 }
 0x1af   :  { %2225 = vrot.lane.b32.xlu1 %v2224_v43, %s2443_s27 }
 0x1b0   :  { %2220 = vrot.lane.b32.xlu0 %v2164_v8, %s2449_s24  ;;  %v2334_v8 = vpack.i.bf16 %v563_v6, %v2892_v5  ;;  %2033 = vmatmul.mubr.msk.bf16.vlgmr.msra.gmra.mrb[4].mxu0 %vm1721_vm5, %v2406_v46  ;;  %v2410_v6 = vld [vmem:[%s3457_s9 + $0x28] sm:$0xff]  }
 0x1b3   :  { %2235 = vrot.lane.b32.xlu1 %v2234_v47, %s2443_s27 }
 0x1b4   :  { %2230 = vrot.lane.b32.xlu0 %v2229_v48, %s2449_s24  ;;  %v2407_v48 = vld [vmem:[%s3457_s9 + $0x10] sm:$0xff]  }
 0x1b5   :  { %2036 = vmatprep.mubr.msk.bf16.mxu0 %vm1721_vm5, %v2407_v48 }
 0x1b7   :  { %2245 = vrot.lane.b32.xlu1 %v2244_v24, %s2442_s4 }
 0x1b8   :  { %2240 = vrot.lane.b32.xlu0 %v2239_v12, %s2442_s4  ;;  %v2408_v12 = vld [vmem:[%s3457_s9 + $0x18] sm:$0xff]  }
 0x1b9   :  { %2037 = vmatmul.mubr.msk.bf16.gmra.mrb[8].mxu0 %vm1721_vm5, %v2408_v12 }
 0x1bb   :  { %2255 = vrot.lane.b32.xlu1 %v2254_v56, %s2444_s28  ;;  %v2409_v56 = vld [vmem:[%s3457_s9 + $0x20] sm:$0xff]  }
 0x1bc   :  { %2250 = vrot.lane.b32.xlu0 %v2249_v32, %s2444_s28  ;;  %2040 = vmatprep.mubr.msk.bf16.mxu0 %vm1721_vm5, %v2409_v56 }
 0x1bf   :  { %2265 = vrot.lane.b32.xlu1 %v2264_v33, %s2445_s14  ;;  %v500_v33 = vld [vmem:[#allocation2] sm:$0xff] }
 0x1c0   :  { %2260 = vrot.lane.b32.xlu0 %v2259_v23, %s2445_s14 }
 0x1c1   :  { %2041 = vmatmul.mubr.msk.bf16.gmra.mrb[12].mxu0 %vm1721_vm5, %v2410_v6 }
 0x1c3   :  { %2275 = vrot.lane.b32.xlu1 %v2274_v22, %s2446_s17 }
 0x1c4   :  { %2270 = vrot.lane.b32.xlu0 %v2269_v58, %s2446_s17 }
 0x1c7   :  { %2285 = vrot.lane.b32.xlu1 %v2284_v25, %s2447_s20 }
 0x1c8   :  { %2280 = vrot.lane.b32.xlu0 %v2279_v60, %s2447_s20 }
 0x1cb   :  { %2295 = vrot.lane.b32.xlu1 %v2294_v61, %s2448_s23 }
 0x1cc   :  { %2290 = vrot.lane.b32.xlu0 %v2234_v47, %s2448_s23  ;;  %v644_v47 = vld [vmem:[#allocation2 + $0x132] sm:$0xff] }
 0x1cd   :  { %v2384_v51 = vpack.i.bf16 %v644_v47, %v595_v16 }
 0x1cf   :  { %2305 = vrot.lane.b32.xlu1 %v2294_v61, %s2443_s27 }
 0x1d0   :  { %2300 = vrot.lane.b32.xlu0 %v2244_v24, %s2449_s24 }
 0x1d3   :  { %2315 = vrot.lane.b32.xlu1 %v2314_v0, %s2443_s27 }
 0x1d4   :  { %2310 = vrot.lane.b32.xlu0 %v2309_v1, %s2449_s24 }
 0x1d7   :  { %2325 = vrot.lane.b32.xlu1 %v2324_v4, %s2442_s4 }
 0x1d8   :  { %2320 = vrot.lane.b32.xlu0 %v2309_v1, %s2442_s4 }
 0x1db   :  { %2335 = vrot.lane.b32.xlu1 %v2334_v8, %s2444_s28 }
 0x1dc   :  { %2330 = vrot.lane.b32.xlu0 %v2329_v10, %s2444_s28 }
 0x1df   :  { %2345 = vrot.lane.b32.xlu1 %v2344_v14, %s2445_s14 }
 0x1e0   :  { %2340 = vrot.lane.b32.xlu0 %v2339_v15, %s2445_s14 }
 0x1e3   :  { %2355 = vrot.lane.b32.xlu1 %v2354_v18, %s2446_s17 }
 0x1e4   :  { %2350 = vrot.lane.b32.xlu0 %v2349_v19, %s2446_s17 }
 0x1e5   :  { %v2907_v21 = vpop.permute.xlu1 %2080 }
 0x1e6   :  { %v2071_v36 = vpop.permute.xlu0 %2070  ;;  %v2083_v25 = vunpack.i.h.bf16 %v2907_v21  ;;  %v2082_v60 = vunpack.i.l.bf16 %v2907_v21 }
 0x1e7   :  { %2365 = vrot.lane.b32.xlu1 %v2364_v37, %s2447_s20  ;;  %v2073_v32 = vunpack.i.h.bf16 %v2071_v36  ;;  %v2072_v17 = vunpack.i.l.bf16 %v2071_v36 }
 0x1e8   :  { %2360 = vrot.lane.b32.xlu0 %v2359_v38, %s2447_s20 }
 0x1e9   :  { %v2086_v42 = vpop.permute.xlu1 %2085  ;;  %v1157_v27 = vsel %vm254_vm2, %v500_v33, %v2072_v17  ;;  %v1158_v61 = vsel %vm254_vm2, %v2788_v30, %v2073_v32  ;;  %v2412_v32 = vld [vmem:[%s3457_s9 + $0x38] sm:$0xff]  }
 0x1ea   :  { %v2076_v43 = vpop.permute.xlu0 %2075  ;;  %v2088_v35 = vunpack.i.h.bf16 %v2086_v42  ;;  %v2087_v62 = vunpack.i.l.bf16 %v2086_v42  ;;  %v1174_v30 = vsel %vm1173_vm6, %v1157_v27, %v2082_v60 }
 0x1eb   :  { %2375 = vrot.lane.b32.xlu1 %v2374_v44, %s2448_s23  ;;  %v2078_v23 = vunpack.i.h.bf16 %v2076_v43  ;;  %v2077_v57 = vunpack.i.l.bf16 %v2076_v43 }
 0x1ec   :  { %2370 = vrot.lane.b32.xlu0 %v2314_v0, %s2448_s23 }
 0x1ed   :  { %v2096_v49 = vpop.permute.xlu1 %2095  ;;  %v1160_v63 = vsel %vm254_vm2, %v2784_v54, %v2078_v23  ;;  %v1159_v0 = vsel %vm254_vm2, %v2790_v55, %v2077_v57  ;;  %v2411_v54 = vld [vmem:[%s3457_s9 + $0x30] sm:$0xff]   ;;  %v1175_v55 = vsel %vm1173_vm6, %v1158_v61, %v2083_v25 }
 0x1ee   :  { %v2091_v50 = vpop.permute.xlu0 %2090  ;;  %v2098_v1 = vunpack.i.h.bf16 %v2096_v49  ;;  %v2097_v2 = vunpack.i.l.bf16 %v2096_v49  ;;  %v1176_v13 = vsel %vm1173_vm6, %v1159_v0, %v2087_v62  ;;  %v1177_v14 = vsel %vm1173_vm6, %v1160_v63, %v2088_v35  ;;  %2044 = vmatprep.mubr.msk.bf16.mxu0 %vm1721_vm5, %v2411_v54 }
 0x1ef   :  { %2385 = vrot.lane.b32.xlu1 %v2384_v51, %s2449_s24  ;;  %v2093_v8 = vunpack.i.h.bf16 %v2091_v50  ;;  %v2092_v10 = vunpack.i.l.bf16 %v2091_v50  ;;  %2045 = vmatmul.mubr.msk.bf16.gmra.mrb[16].mxu0 %vm1721_vm5, %v2412_v32 }
 0x1f0   :  { %2380 = vrot.lane.b32.xlu0 %v2324_v4, %s2449_s24  ;;  %v1193_v18 = vsel %vm1190_vm7, %v1176_v13, %v2097_v2  ;;  %v1194_v19 = vsel %vm1190_vm7, %v1177_v14, %v2098_v1 }
 0x1f1   :  { %v2934_v52 = vpop.permute.xlu1 %2105  ;;  %v1191_v38 = vsel %vm1190_vm7, %v1174_v30, %v2092_v10  ;;  %v1192_v39 = vsel %vm1190_vm7, %v1175_v55, %v2093_v8 }
 0x1f2   :  { %v2101_v24 = vpop.permute.xlu0 %2100  ;;  %v2108_v42 = vunpack.i.h.bf16 %v2934_v52  ;;  %v2107_v43 = vunpack.i.l.bf16 %v2934_v52 }
 0x1f3   :  { %v2103_v15 = vunpack.i.h.bf16 %v2101_v24  ;;  %v2102_v16 = vunpack.i.l.bf16 %v2101_v24 }
 0x1f4   :  { %v1210_v27 = vsel %vm1207_vm8, %v1193_v18, %v2107_v43  ;;  %v1211_v61 = vsel %vm1207_vm8, %v1194_v19, %v2108_v42 }
 0x1f5   :  { %v2942_v22 = vpop.permute.xlu1 %2115  ;;  %v1208_v46 = vsel %vm1207_vm8, %v1191_v38, %v2102_v16  ;;  %v1209_v47 = vsel %vm1207_vm8, %v1192_v39, %v2103_v15 }
 0x1f6   :  { %v2111_v58 = vpop.permute.xlu0 %2110  ;;  %v2118_v48 = vunpack.i.h.bf16 %v2942_v22  ;;  %v2117_v49 = vunpack.i.l.bf16 %v2942_v22 }
 0x1f7   :  { %v2113_v20 = vunpack.i.h.bf16 %v2111_v58  ;;  %v2112_v21 = vunpack.i.l.bf16 %v2111_v58 }
 0x1f8   :  { %v1227_v63 = vsel %vm1224_vm9, %v1210_v27, %v2117_v49  ;;  %v1228_v0 = vsel %vm1224_vm9, %v1211_v61, %v2118_v48 }
 0x1f9   :  { %v2955_v3 = vpop.permute.xlu1 %2125  ;;  %v1225_v50 = vsel %vm1224_vm9, %v1208_v46, %v2112_v21  ;;  %v1226_v51 = vsel %vm1224_vm9, %v1209_v47, %v2113_v20 }
 0x1fa   :  { %v2121_v4 = vpop.permute.xlu0 %2120  ;;  %v2128_v24 = vunpack.i.h.bf16 %v2955_v3  ;;  %v2127_v12 = vunpack.i.l.bf16 %v2955_v3 }
 0x1fb   :  { %v2123_v40 = vunpack.i.h.bf16 %v2121_v4  ;;  %v2122_v41 = vunpack.i.l.bf16 %v2121_v4 }
 0x1fc   :  { %v1244_v4 = vsel %vm1241_vm10, %v1227_v63, %v2127_v12  ;;  %v1245_v6 = vsel %vm1241_vm10, %v1228_v0, %v2128_v24 }
 0x1fd   :  { %v2136_v36 = vpop.permute.xlu1 %2135  ;;  %v1242_v17 = vsel %vm1241_vm10, %v1225_v50, %v2122_v41  ;;  %v1243_v33 = vsel %vm1241_vm10, %v1226_v51, %v2123_v40 }
 0x1fe   :  { %v2131_v37 = vpop.permute.xlu0 %2130  ;;  %v2138_v22 = vunpack.i.h.bf16 %v2136_v36  ;;  %v2137_v58 = vunpack.i.l.bf16 %v2136_v36 }
 0x1ff   :  { %v2133_v44 = vunpack.i.h.bf16 %v2131_v37  ;;  %v2132_v45 = vunpack.i.l.bf16 %v2131_v37 }
 0x200   :  { %v1261_v54 = vsel %vm1258_vm11, %v1244_v4, %v2137_v58  ;;  %v1262_v30 = vsel %vm1258_vm11, %v1245_v6, %v2138_v22 }
 0x201   :  { %v2146_v56 = vpop.permute.xlu1 %2145  ;;  %v1259_v25 = vsel %vm1258_vm11, %v1242_v17, %v2132_v45  ;;  %v1260_v60 = vsel %vm1258_vm11, %v1243_v33, %v2133_v44 }
 0x202   :  { %v2141_v52 = vpop.permute.xlu0 %2140  ;;  %v2148_v40 = vunpack.i.h.bf16 %v2146_v56  ;;  %v2147_v41 = vunpack.i.l.bf16 %v2146_v56 }
 0x203   :  { %v2143_v23 = vunpack.i.h.bf16 %v2141_v52  ;;  %v2142_v57 = vunpack.i.l.bf16 %v2141_v52 }
 0x204   :  { %v1162_v52 = vsel %vm254_vm2, %v2808_v59, %v2148_v40  ;;  %v1161_v56 = vsel %vm254_vm2, %v2786_v29, %v2147_v41 }
 0x205   :  { %v1276_v35 = vsel %vm1275_vm12, %v1259_v25, %v2142_v57  ;;  %v1277_v62 = vsel %vm1275_vm12, %v1260_v60, %v2143_v23  ;;  %v2156_v2 = vpop.permute.xlu1 %2155 }
 0x206   :  { %v1292_v1 = vpack.c.bf16 %v1277_v62, %v1276_v35  ;;  %v2151_v3 = vpop.permute.xlu0 %2150  ;;  %v2158_v38 = vunpack.i.h.bf16 %v2156_v2  ;;  %v2157_v39 = vunpack.i.l.bf16 %v2156_v2 }
 0x207   :  { %v2153_v8 = vunpack.i.h.bf16 %v2151_v3  ;;  %v2152_v10 = vunpack.i.l.bf16 %v2151_v3 }
 0x208   :  { %2014 = vmatprep.mubr.msk.bf16.mxu1 %vm1343_vm13, %v1292_v1  ;;  %v1164_v50 = vsel %vm254_vm2, %v2833_v9, %v2158_v38  ;;  %v1163_v51 = vsel %vm254_vm2, %v2835_v11, %v2157_v39 }
 0x209   :  { %v1278_v55 = vsel %vm1275_vm12, %v1261_v54, %v2152_v10  ;;  %v1279_v13 = vsel %vm1275_vm12, %v1262_v30, %v2153_v8  ;;  %v2166_v15 = vpop.permute.xlu1 %2165 }
 0x20a   :  { %v1293_v14 = vpack.c.bf16 %v1279_v13, %v1278_v55  ;;  %v2161_v16 = vpop.permute.xlu0 %2160  ;;  %v2168_v42 = vunpack.i.h.bf16 %v2166_v15  ;;  %v2167_v43 = vunpack.i.l.bf16 %v2166_v15 }
 0x20b   :  { %v2163_v44 = vunpack.i.h.bf16 %v2161_v16  ;;  %v2162_v45 = vunpack.i.l.bf16 %v2161_v16 }
 0x20c   :  { %2015 = vmatmul.mubr.msk.bf16.vlgmr.msra.gmra.mrb[12].mxu1 %vm1343_vm13, %v1293_v14  ;;  %v1180_v32 = vsel %vm1173_vm6, %v1163_v51, %v2167_v43  ;;  %v1181_v17 = vsel %vm1173_vm6, %v1164_v50, %v2168_v42 }
 0x20d   :  { %v2176_v18 = vpop.permute.xlu1 %2175  ;;  %v1179_v33 = vsel %vm1173_vm6, %v1162_v52, %v2163_v44  ;;  %v1178_v23 = vsel %vm1173_vm6, %v1161_v56, %v2162_v45 }
 0x20e   :  { %v2171_v19 = vpop.permute.xlu0 %2170  ;;  %v2178_v46 = vunpack.i.h.bf16 %v2176_v18  ;;  %v2177_v47 = vunpack.i.l.bf16 %v2176_v18 }
 0x20f   :  { %v2173_v24 = vunpack.i.h.bf16 %v2171_v19  ;;  %v2172_v12 = vunpack.i.l.bf16 %v2171_v19 }
 0x210   :  { %v1197_v11 = vsel %vm1190_vm7, %v1180_v32, %v2177_v47  ;;  %v1198_v22 = vsel %vm1190_vm7, %v1181_v17, %v2178_v46 }
 0x211   :  { %v3005_v20 = vpop.permute.xlu1 %2185  ;;  %v1195_v29 = vsel %vm1190_vm7, %v1178_v23, %v2172_v12  ;;  %v1196_v27 = vsel %vm1190_vm7, %v1179_v33, %v2173_v24 }
 0x212   :  { %v2181_v21 = vpop.permute.xlu0 %2180  ;;  %v2188_v62 = vunpack.i.h.bf16 %v3005_v20  ;;  %v2187_v63 = vunpack.i.l.bf16 %v3005_v20 }
 0x213   :  { %v2183_v9 = vunpack.i.h.bf16 %v2181_v21  ;;  %v2182_v57 = vunpack.i.l.bf16 %v2181_v21 }
 0x214   :  { %v1215_v38 = vsel %vm1207_vm8, %v1198_v22, %v2188_v62 }
 0x215   :  { %v3007_v36 = vpop.permute.xlu1 %2195  ;;  %v1212_v2 = vsel %vm1207_vm8, %v1195_v29, %v2182_v57  ;;  %v1213_v3 = vsel %vm1207_vm8, %v1196_v27, %v2183_v9  ;;  %v508_v27 = vld [vmem:[#allocation2 + $0xa0] sm:$0xff] }
 0x216   :  { %v2191_v37 = vpop.permute.xlu0 %2190  ;;  %v2198_v4 = vunpack.i.h.bf16 %v3007_v36  ;;  %v2197_v6 = vunpack.i.l.bf16 %v3007_v36 }
 0x217   :  { %v2193_v58 = vunpack.i.h.bf16 %v2191_v37  ;;  %v2192_v25 = vunpack.i.l.bf16 %v2191_v37  ;;  %v1214_v37 = vsel %vm1207_vm8, %v1197_v11, %v2187_v63 }
 0x218   :  { %v1231_v41 = vsel %vm1224_vm9, %v1214_v37, %v2197_v6  ;;  %v1232_v42 = vsel %vm1224_vm9, %v1215_v38, %v2198_v4 }
 0x219   :  { %v2206_v48 = vpop.permute.xlu1 %2205  ;;  %v1229_v8 = vsel %vm1224_vm9, %v1212_v2, %v2192_v25  ;;  %v1230_v10 = vsel %vm1224_vm9, %v1213_v3, %v2193_v58 }
 0x21a   :  { %v2201_v49 = vpop.permute.xlu0 %2200  ;;  %v2208_v54 = vunpack.i.h.bf16 %v2206_v48  ;;  %v2207_v30 = vunpack.i.l.bf16 %v2206_v48 }
 0x21b   :  { %v2203_v61 = vunpack.i.h.bf16 %v2201_v49  ;;  %v2202_v35 = vunpack.i.l.bf16 %v2201_v49 }
 0x21c   :  { %v1248_v46 = vsel %vm1241_vm10, %v1231_v41, %v2207_v30  ;;  %v1249_v47 = vsel %vm1241_vm10, %v1232_v42, %v2208_v54 }
 0x21d   :  { %v2216_v59 = vpop.permute.xlu1 %2215  ;;  %v1246_v14 = vsel %vm1241_vm10, %v1229_v8, %v2202_v35  ;;  %v1247_v15 = vsel %vm1241_vm10, %v1230_v10, %v2203_v61 }
 0x21e   :  { %v2211_v60 = vpop.permute.xlu0 %2210  ;;  %v2218_v19 = vunpack.i.h.bf16 %v2216_v59  ;;  %v2217_v20 = vunpack.i.l.bf16 %v2216_v59 }
 0x21f   :  { %v2213_v0 = vunpack.i.h.bf16 %v2211_v60  ;;  %v2212_v1 = vunpack.i.l.bf16 %v2211_v60 }
 0x220   :  { %v1265_v50 = vsel %vm1258_vm11, %v1248_v46, %v2217_v20  ;;  %v1266_v51 = vsel %vm1258_vm11, %v1249_v47, %v2218_v19 }
 0x221   :  { %v2226_v55 = vpop.permute.xlu1 %2225  ;;  %v1263_v21 = vsel %vm1258_vm11, %v1246_v14, %v2212_v1  ;;  %v1264_v36 = vsel %vm1258_vm11, %v1247_v15, %v2213_v0 }
 0x222   :  { %v2221_v13 = vpop.permute.xlu0 %2220  ;;  %v2228_v25 = vunpack.i.h.bf16 %v2226_v55  ;;  %v2227_v59 = vunpack.i.l.bf16 %v2226_v55 }
 0x223   :  { %v2223_v16 = vunpack.i.h.bf16 %v2221_v13  ;;  %v2222_v18 = vunpack.i.l.bf16 %v2221_v13 }
 0x224   :  { %v1166_v8 = vsel %vm254_vm2, %v2862_v53, %v2228_v25  ;;  %v1165_v10 = vsel %vm254_vm2, %v508_v27, %v2227_v59 }
 0x225   :  { %v1280_v39 = vsel %vm1275_vm12, %v1263_v21, %v2222_v18  ;;  %v1281_v40 = vsel %vm1275_vm12, %v1264_v36, %v2223_v16  ;;  %v2236_v44 = vpop.permute.xlu1 %2235 }
 0x226   :  { %v1294_v43 = vpack.c.bf16 %v1281_v40, %v1280_v39  ;;  %v2231_v45 = vpop.permute.xlu0 %2230  ;;  %v2238_v22 = vunpack.i.h.bf16 %v2236_v44  ;;  %v2237_v58 = vunpack.i.l.bf16 %v2236_v44 }
 0x227   :  { %v2233_v48 = vunpack.i.h.bf16 %v2231_v45  ;;  %v2232_v49 = vunpack.i.l.bf16 %v2231_v45 }
 0x228   :  { %2018 = vmatprep.mubr.msk.bf16.mxu1 %vm1343_vm13, %v1294_v43  ;;  %v1168_v2 = vsel %vm254_vm2, %v2858_v26, %v2238_v22  ;;  %v1167_v3 = vsel %vm254_vm2, %v2864_v31, %v2237_v58 }
 0x229   :  { %v1283_v24 = vsel %vm1275_vm12, %v1266_v51, %v2233_v48  ;;  %v1282_v12 = vsel %vm1275_vm12, %v1265_v50, %v2232_v49  ;;  %v2246_v56 = vpop.permute.xlu1 %2245 }
 0x22a   :  { %v1295_v52 = vpack.c.bf16 %v1283_v24, %v1282_v12  ;;  %v2241_v32 = vpop.permute.xlu0 %2240  ;;  %v2248_v60 = vunpack.i.h.bf16 %v2246_v56  ;;  %v2247_v29 = vunpack.i.l.bf16 %v2246_v56 }
 0x22b   :  { %v2243_v61 = vunpack.i.h.bf16 %v2241_v32  ;;  %v2242_v35 = vunpack.i.l.bf16 %v2241_v32 }
 0x22c   :  { %2019 = vmatmul.mubr.msk.bf16.gmra.mrb[16].mxu1 %vm1343_vm13, %v1295_v52  ;;  %v1184_v54 = vsel %vm1173_vm6, %v1167_v3, %v2247_v29  ;;  %v1185_v30 = vsel %vm1173_vm6, %v1168_v2, %v2248_v60 }
 0x22d   :  { %v2256_v17 = vpop.permute.xlu1 %2255  ;;  %v1183_v55 = vsel %vm1173_vm6, %v1166_v8, %v2243_v61  ;;  %v1182_v13 = vsel %vm1173_vm6, %v1165_v10, %v2242_v35 }
 0x22e   :  { %v2251_v33 = vpop.permute.xlu0 %2250  ;;  %v2258_v62 = vunpack.i.h.bf16 %v2256_v17  ;;  %v2257_v63 = vunpack.i.l.bf16 %v2256_v17 }
 0x22f   :  { %v2253_v4 = vunpack.i.h.bf16 %v2251_v33  ;;  %v2252_v6 = vunpack.i.l.bf16 %v2251_v33 }
 0x230   :  { %v1201_v15 = vsel %vm1190_vm7, %v1184_v54, %v2257_v63  ;;  %v1202_v31 = vsel %vm1190_vm7, %v1185_v30, %v2258_v62 }
 0x231   :  { %v3051_v23 = vpop.permute.xlu1 %2265  ;;  %v1199_v20 = vsel %vm1190_vm7, %v1182_v13, %v2252_v6  ;;  %v1200_v21 = vsel %vm1190_vm7, %v1183_v55, %v2253_v4 }
 0x232   :  { %v2261_v9 = vpop.permute.xlu0 %2260  ;;  %v2268_v38 = vunpack.i.h.bf16 %v3051_v23  ;;  %v2267_v39 = vunpack.i.l.bf16 %v3051_v23 }
 0x233   :  { %v2263_v14 = vunpack.i.h.bf16 %v2261_v9  ;;  %v2262_v26 = vunpack.i.l.bf16 %v2261_v9 }
 0x234   :  { %v1218_v9 = vsel %vm1207_vm8, %v1201_v15, %v2267_v39 }
 0x235   :  { %v3053_v57 = vpop.permute.xlu1 %2275  ;;  %v1216_v42 = vsel %vm1207_vm8, %v1199_v20, %v2262_v26  ;;  %v1217_v43 = vsel %vm1207_vm8, %v1200_v21, %v2263_v14 }
 0x236   :  { %v2271_v11 = vpop.permute.xlu0 %2270  ;;  %v2278_v44 = vunpack.i.h.bf16 %v3053_v57  ;;  %v2277_v45 = vunpack.i.l.bf16 %v3053_v57  ;;  %v1219_v57 = vsel %vm1207_vm8, %v1202_v31, %v2268_v38 }
 0x237   :  { %v2273_v16 = vunpack.i.h.bf16 %v2271_v11  ;;  %v2272_v18 = vunpack.i.l.bf16 %v2271_v11 }
 0x238   :  { %v1235_v58 = vsel %vm1224_vm9, %v1218_v9, %v2277_v45  ;;  %v1236_v25 = vsel %vm1224_vm9, %v1219_v57, %v2278_v44 }
 0x239   :  { %v2286_v0 = vpop.permute.xlu1 %2285  ;;  %v1233_v46 = vsel %vm1224_vm9, %v1216_v42, %v2272_v18  ;;  %v1234_v47 = vsel %vm1224_vm9, %v1217_v43, %v2273_v16 }
 0x23a   :  { %v2281_v1 = vpop.permute.xlu0 %2280  ;;  %v2288_v48 = vunpack.i.h.bf16 %v2286_v0  ;;  %v2287_v49 = vunpack.i.l.bf16 %v2286_v0 }
 0x23b   :  { %v2283_v36 = vunpack.i.h.bf16 %v2281_v1  ;;  %v2282_v37 = vunpack.i.l.bf16 %v2281_v1 }
 0x23c   :  { %v1252_v27 = vsel %vm1241_vm10, %v1235_v58, %v2287_v49  ;;  %v1253_v61 = vsel %vm1241_vm10, %v1236_v25, %v2288_v48 }
 0x23d   :  { %v2296_v19 = vpop.permute.xlu1 %2295  ;;  %v1250_v24 = vsel %vm1241_vm10, %v1233_v46, %v2282_v37  ;;  %v1251_v12 = vsel %vm1241_vm10, %v1234_v47, %v2283_v36 }
 0x23e   :  { %v2291_v53 = vpop.permute.xlu0 %2290  ;;  %v2298_v32 = vunpack.i.h.bf16 %v2296_v19  ;;  %v2297_v17 = vunpack.i.l.bf16 %v2296_v19 }
 0x23f   :  { %v2293_v40 = vunpack.i.h.bf16 %v2291_v53  ;;  %v2292_v41 = vunpack.i.l.bf16 %v2291_v53 }
 0x240   :  { %v1269_v63 = vsel %vm1258_vm11, %v1252_v27, %v2297_v17  ;;  %v1270_v0 = vsel %vm1258_vm11, %v1253_v61, %v2298_v32 }
 0x241   :  { %v2306_v50 = vpop.permute.xlu1 %2305  ;;  %v1267_v33 = vsel %vm1258_vm11, %v1250_v24, %v2292_v41  ;;  %v1268_v23 = vsel %vm1258_vm11, %v1251_v12, %v2293_v40 }
 0x242   :  { %v2301_v51 = vpop.permute.xlu0 %2300  ;;  %v2308_v55 = vunpack.i.h.bf16 %v2306_v50  ;;  %v2307_v13 = vunpack.i.l.bf16 %v2306_v50 }
 0x243   :  { %v2303_v52 = vunpack.i.h.bf16 %v2301_v51  ;;  %v2302_v56 = vunpack.i.l.bf16 %v2301_v51 }
 0x244   :  { %v1170_v38 = vsel %vm254_vm2, %v2876_v34, %v2308_v55  ;;  %v1169_v39 = vsel %vm254_vm2, %v2860_v28, %v2307_v13 }
 0x245   :  { %v1284_v11 = vsel %vm1275_vm12, %v1267_v33, %v2302_v56  ;;  %v1285_v22 = vsel %vm1275_vm12, %v1268_v23, %v2303_v52  ;;  %v2316_v60 = vpop.permute.xlu1 %2315 }
 0x246   :  { %v1296_v59 = vpack.c.bf16 %v1285_v22, %v1284_v11  ;;  %v2311_v29 = vpop.permute.xlu0 %2310  ;;  %v2318_v14 = vunpack.i.h.bf16 %v2316_v60  ;;  %v2317_v26 = vunpack.i.l.bf16 %v2316_v60 }
 0x247   :  { %v2313_v35 = vunpack.i.h.bf16 %v2311_v29  ;;  %v2312_v62 = vunpack.i.l.bf16 %v2311_v29 }
 0x248   :  { %2022 = vmatprep.mubr.msk.bf16.mxu1 %vm1343_vm13, %v1296_v59  ;;  %v1172_v40 = vsel %vm254_vm2, %v2892_v5, %v2318_v14  ;;  %v1171_v41 = vsel %vm254_vm2, %v2894_v7, %v2317_v26 }
 0x249   :  { %v1287_v1 = vsel %vm1275_vm12, %v1270_v0, %v2313_v35  ;;  %v1286_v2 = vsel %vm1275_vm12, %v1269_v63, %v2312_v62  ;;  %v2326_v4 = vpop.permute.xlu1 %2325 }
 0x24a   :  { %v1297_v3 = vpack.c.bf16 %v1287_v1, %v1286_v2  ;;  %v2321_v6 = vpop.permute.xlu0 %2320  ;;  %v2328_v15 = vunpack.i.h.bf16 %v2326_v4  ;;  %v2327_v31 = vunpack.i.l.bf16 %v2326_v4 }
 0x24b   :  { %v2323_v16 = vunpack.i.h.bf16 %v2321_v6  ;;  %v2322_v18 = vunpack.i.l.bf16 %v2321_v6 }
 0x24c   :  { %2023 = vmatmul.mubr.msk.bf16.gmra.mrb[20].mxu1 %vm1343_vm13, %v1297_v3  ;;  %v1188_v42 = vsel %vm1173_vm6, %v1171_v41, %v2327_v31  ;;  %v1189_v43 = vsel %vm1173_vm6, %v1172_v40, %v2328_v15 }
 0x24d   :  { %v2336_v8 = vpop.permute.xlu1 %2335  ;;  %v1187_v44 = vsel %vm1173_vm6, %v1170_v38, %v2323_v16  ;;  %v1186_v45 = vsel %vm1173_vm6, %v1169_v39, %v2322_v18 }
 0x24e   :  { %v2331_v10 = vpop.permute.xlu0 %2330  ;;  %v2338_v20 = vunpack.i.h.bf16 %v2336_v8  ;;  %v2337_v21 = vunpack.i.l.bf16 %v2336_v8 }
 0x24f   :  { %v2333_v36 = vunpack.i.h.bf16 %v2331_v10  ;;  %v2332_v37 = vunpack.i.l.bf16 %v2331_v10 }
 0x250   :  { %v1205_v50 = vsel %vm1190_vm7, %v1188_v42, %v2337_v21  ;;  %v1206_v5 = vsel %vm1190_vm7, %v1189_v43, %v2338_v20  ;;  %v3137_v20 = vld [vmem:[%s3454_s6] ss:$0 sm:$0xff] }
 0x251   :  { %v2346_v54 = vpop.permute.xlu1 %2345  ;;  %v1203_v7 = vsel %vm1190_vm7, %v1186_v45, %v2332_v37  ;;  %v1204_v51 = vsel %vm1190_vm7, %v1187_v44, %v2333_v36 }
 0x252   :  { %v2341_v30 = vpop.permute.xlu0 %2340  ;;  %v2348_v34 = vunpack.i.h.bf16 %v2346_v54  ;;  %v2347_v48 = vunpack.i.l.bf16 %v2346_v54 }
 0x253   :  { %v2343_v49 = vunpack.i.h.bf16 %v2341_v30  ;;  %v2342_v28 = vunpack.i.l.bf16 %v2341_v30 }
 0x254   :  { %v1222_v11 = vsel %vm1207_vm8, %v1205_v50, %v2347_v48  ;;  %v1223_v22 = vsel %vm1207_vm8, %v1206_v5, %v2348_v34 }
 0x255   :  { %v2356_v19 = vpop.permute.xlu1 %2355  ;;  %v1220_v58 = vsel %vm1207_vm8, %v1203_v7, %v2342_v28  ;;  %v1221_v25 = vsel %vm1207_vm8, %v1204_v51, %v2343_v49 }
 0x256   :  { %v2351_v53 = vpop.permute.xlu0 %2350  ;;  %v2358_v24 = vunpack.i.h.bf16 %v2356_v19  ;;  %v2357_v12 = vunpack.i.l.bf16 %v2356_v19 }
 0x257   :  { %v2353_v52 = vunpack.i.h.bf16 %v2351_v53  ;;  %v2352_v56 = vunpack.i.l.bf16 %v2351_v53 }
 0x258   :  { %v1239_v61 = vsel %vm1224_vm9, %v1222_v11, %v2357_v12  ;;  %v1240_v35 = vsel %vm1224_vm9, %v1223_v22, %v2358_v24 }
 0x259   :  { %v2366_v46 = vpop.permute.xlu1 %2365  ;;  %v1237_v62 = vsel %vm1224_vm9, %v1220_v58, %v2352_v56  ;;  %v1238_v63 = vsel %vm1224_vm9, %v1221_v25, %v2353_v52 }
 0x25a   :  { %v2361_v47 = vpop.permute.xlu0 %2360  ;;  %v2368_v32 = vunpack.i.h.bf16 %v2366_v46  ;;  %v2367_v17 = vunpack.i.l.bf16 %v2366_v46 }
 0x25b   :  { %v2363_v33 = vunpack.i.h.bf16 %v2361_v47  ;;  %v2362_v23 = vunpack.i.l.bf16 %v2361_v47 }
 0x25c   :  { %v1256_v0 = vsel %vm1241_vm10, %v1239_v61, %v2367_v17  ;;  %v1257_v1 = vsel %vm1241_vm10, %v1240_v35, %v2368_v32 }
 0x25d   :  { %v2376_v9 = vpop.permute.xlu1 %2375  ;;  %v1254_v2 = vsel %vm1241_vm10, %v1237_v62, %v2362_v23  ;;  %v1255_v3 = vsel %vm1241_vm10, %v1238_v63, %v2363_v33 }
 0x25e   :  { %v2371_v57 = vpop.permute.xlu0 %2370  ;;  %v2378_v59 = vunpack.i.h.bf16 %v2376_v9  ;;  %v2377_v60 = vunpack.i.l.bf16 %v2376_v9 }
 0x25f   :  { %v2373_v29 = vunpack.i.h.bf16 %v2371_v57  ;;  %v2372_v27 = vunpack.i.l.bf16 %v2371_v57 }
 0x260   :  { %v1273_v55 = vsel %vm1258_vm11, %v1256_v0, %v2377_v60  ;;  %v1274_v13 = vsel %vm1258_vm11, %v1257_v1, %v2378_v59 }
 0x261   :  { %v2386_v4 = vpop.permute.xlu1 %2385  ;;  %v1271_v14 = vsel %vm1258_vm11, %v1254_v2, %v2372_v27  ;;  %v1272_v26 = vsel %vm1258_vm11, %v1255_v3, %v2373_v29 }
 0x262   :  { %v2381_v6 = vpop.permute.xlu0 %2380  ;;  %v2388_v8 = vunpack.i.h.bf16 %v2386_v4  ;;  %v2387_v10 = vunpack.i.l.bf16 %v2386_v4 }
 0x263   :  { %v2383_v54 = vunpack.i.h.bf16 %v2381_v6  ;;  %v2382_v30 = vunpack.i.l.bf16 %v2381_v6 }
 0x264   :  { %v1290_v15 = vsel %vm1275_vm12, %v1273_v55, %v2387_v10  ;;  %v1291_v31 = vsel %vm1275_vm12, %v1274_v13, %v2388_v8 }
 0x265   :  { %v1288_v16 = vsel %vm1275_vm12, %v1271_v14, %v2382_v30  ;;  %v1289_v18 = vsel %vm1275_vm12, %v1272_v26, %v2383_v54  ;;  %v1299_v19 = vpack.c.bf16 %v1291_v31, %v1290_v15 }
 0x266   :  { %v1298_v53 = vpack.c.bf16 %v1289_v18, %v1288_v16 }
 0x268   :  { %2026 = vmatprep.mubr.msk.bf16.mxu1 %vm1343_vm13, %v1298_v53 }
 0x269   :  { %2027 = vmatmul.mubr.msk.bf16.gmra.mrb[24].mxu1 %vm1343_vm13, %v1299_v19 }
 0x283   :  { %v3179_v57 = vpop.f32.mrb[4].mxu0 }
 0x284   :  { %v3181_v22 = vpop.f32.mrb[5].mxu0 }
 0x285   :  { %v3183_v58 = vpop.f32.mrb[6].mxu0 }
 0x286   :  { %v3185_v25 = vpop.f32.mrb[7].mxu0 }
 0x28c   :  { %v3187_v59 = vpop.f32.mrb[8].mxu0 }
 0x28d   :  { %v3189_v60 = vpop.f32.mrb[9].mxu0 }
 0x28e   :  { %v3191_v29 = vpop.f32.mrb[10].mxu0 }
 0x28f   :  { %v3193_v27 = vpop.f32.mrb[11].mxu0 }
 0x294   :  { %v3195_v61 = vpop.f32.mrb[12].mxu0 }
 0x295   :  { %v3197_v35 = vpop.f32.mrb[13].mxu0 }
 0x296   :  { %v3199_v62 = vpop.f32.mrb[14].mxu0 }
 0x297   :  { %v3201_v63 = vpop.f32.mrb[15].mxu0 }
 0x2c2   :  { %v3207_v54 = vpop.f32.mrb[16].mxu0 }
 0x2c3   :  { %v3209_v55 = vpop.f32.mrb[17].mxu0 }
 0x2c4   :  { %v3213_v26 = vpop.f32.mrb[18].mxu0 }
 0x2c5   :  { %v3215_v31 = vpop.f32.mrb[19].mxu0 }
 0x2df   :  { %v2016_v21 = vpop.f32.mrb[12].mxu1 }
 0x2e0   :  { %v1406_v36 = vpop.f32.mrb[13].mxu1  ;;  %v3143_v40 = vadd.f32 %v2016_v21, %v3137_v20 }
 0x2e1   :  { %v3140_v37 = vadd.f32 %v3137_v20, %v1406_v36  ;;  %v2017_v38 = vpop.f32.mrb[14].mxu1 }
 0x2e2   :  { %v1409_v39 = vpop.f32.mrb[15].mxu1  ;;  %v3151_v43 = vadd.f32 %v2017_v38, %v3137_v20  ;;  %v1474_v46 = vsel %vm1173_vm6, %v3143_v40, 0.0 }
 0x2e3   :  { %v3146_v41 = vadd.f32 %v3137_v20, %v1409_v39  ;;  %v1471_v42 = vsel %vm1173_vm6, %v3140_v37, 0.0 }
 0x2e4   :  { %v1476_v34 = vsel %vm1173_vm6, %v3151_v43, 0.0 }
 0x2e5   :  { %v1472_v44 = vsel %vm1173_vm6, %v3146_v41, 0.0 }
 0x2e6   :  { %v1473_v45 = vadd.f32 %v1472_v44, %v1471_v42 }
 0x2e8   :  { %v1475_v47 = vadd.f32 %v1474_v46, %v1473_v45 }
 0x2ea   :  { %v1477_v48 = vadd.f32 %v1476_v34, %v1475_v47 }
 0x2ff   :  { %v2020_v49 = vpop.f32.mrb[16].mxu1 }
 0x300   :  { %v1422_v28 = vpop.f32.mrb[17].mxu1  ;;  %v3163_v51 = vadd.f32 %v2020_v49, %v3137_v20 }
 0x301   :  { %v3160_v50 = vadd.f32 %v3137_v20, %v1422_v28  ;;  %v2021_v5 = vpop.f32.mrb[18].mxu1 }
 0x302   :  { %v1425_v7 = vpop.f32.mrb[19].mxu1  ;;  %v3171_v56 = vadd.f32 %v2021_v5, %v3137_v20  ;;  %v1482_v33 = vsel %vm1173_vm6, %v3163_v51, 0.0 }
 0x303   :  { %v1478_v24 = vsel %vm1173_vm6, %v3160_v50, 0.0  ;;  %v3168_v12 = vadd.f32 %v3137_v20, %v1425_v7 }
 0x304   :  { %v1479_v52 = vadd.f32 %v1478_v24, %v1477_v48  ;;  %v1484_v9 = vsel %vm1173_vm6, %v3171_v56, 0.0 }
 0x305   :  { %v1480_v32 = vsel %vm1173_vm6, %v3168_v12, 0.0 }
 0x306   :  { %v1481_v17 = vadd.f32 %v1480_v32, %v1479_v52 }
 0x308   :  { %v1483_v23 = vadd.f32 %v1482_v33, %v1481_v17 }
 0x30a   :  { %v1485_v11 = vadd.f32 %v1484_v9, %v1483_v23 }
 0x31f   :  { %v2024_v0 = vpop.f32.mrb[20].mxu1 }
 0x320   :  { %v1438_v1 = vpop.f32.mrb[21].mxu1  ;;  %v1447_v6 = vadd.f32 %v2024_v0, %v3137_v20 }
 0x321   :  { %v1439_v2 = vadd.f32 %v3137_v20, %v1438_v1  ;;  %v2025_v3 = vpop.f32.mrb[22].mxu1 }
 0x322   :  { %v1441_v4 = vpop.f32.mrb[23].mxu1  ;;  %v1450_v13 = vadd.f32 %v2025_v3, %v3137_v20  ;;  %v1490_v16 = vsel %vm1173_vm6, %v1447_v6, 0.0 }
 0x323   :  { %v1486_v8 = vsel %vm1173_vm6, %v1439_v2, 0.0  ;;  %v1442_v10 = vadd.f32 %v3137_v20, %v1441_v4 }
 0x324   :  { %v1487_v30 = vadd.f32 %v1486_v8, %v1485_v11  ;;  %v1492_v19 = vsel %vm1173_vm6, %v1450_v13, 0.0 }
 0x325   :  { %v1488_v14 = vsel %vm1173_vm6, %v1442_v10, 0.0 }
 0x326   :  { %v1489_v15 = vadd.f32 %v1488_v14, %v1487_v30 }
 0x328   :  { %v1491_v18 = vadd.f32 %v1490_v16, %v1489_v15 }
 0x32a   :  { %v1493_v53 = vadd.f32 %v1492_v19, %v1491_v18 }
 0x33c   :  { %v2028_v21 = vpop.f32.mrb[24].mxu1 }
 0x33d   :  { %v1454_v36 = vpop.f32.mrb[25].mxu1  ;;  %v1463_v44 = vadd.f32 %v2028_v21, %v3137_v20 }
 0x33e   :  { %v1455_v38 = vadd.f32 %v3137_v20, %v1454_v36  ;;  %v2029_v39 = vpop.f32.mrb[26].mxu1 }
 0x33f   :  { %v1457_v42 = vpop.f32.mrb[27].mxu1  ;;  %v1466_v34 = vadd.f32 %v2029_v39, %v3137_v20  ;;  %v1498_v28 = vsel %vm1173_vm6, %v1463_v44, 0.0 }
 0x340   :  { %v1494_v45 = vsel %vm1173_vm6, %v1455_v38, 0.0  ;;  %v1458_v46 = vadd.f32 %v3137_v20, %v1457_v42 }
 0x341   :  { %v1495_v47 = vadd.f32 %v1494_v45, %v1493_v53  ;;  %v1500_v7 = vsel %vm1173_vm6, %v1466_v34, 0.0 }
 0x342   :  { %v1496_v48 = vsel %vm1173_vm6, %v1458_v46, 0.0 }
 0x343   :  { %v1497_v49 = vadd.f32 %v1496_v48, %v1495_v47 }
 0x345   :  { %v1499_v5 = vadd.f32 %v1498_v28, %v1497_v49 }
 0x347   :  { %v1501_v24 = vadd.f32 %v1500_v7, %v1499_v5 }
 0x349   :  { %v1502_v52 = vrot.slane %v1501_v24, 4 }
 0x34b   :  { %v1503_v32 = vadd.f32 %v1502_v52, %v1501_v24 }
 0x34d   :  { %v1504_v17 = vrot.slane %v1503_v32, 2 }
 0x34f   :  { %v1505_v33 = vadd.f32 %v1504_v17, %v1503_v32 }
 0x351   :  { %v1506_v23 = vrot.slane %v1505_v33, 1 }
 0x353   :  { %v1507_v9 = vadd.f32 %v1506_v23, %v1505_v33 }
 0x355   :  { %v1508_v11 = vmul.f32 0.0078125, %v1507_v9 }
 0x357   :  { %v3228_v0 = vsub.f32 %v3140_v37, %v1508_v11  ;;  %v3231_v20 = vsub.f32 %v3146_v41, %v1508_v11  ;;  %v3234_v1 = vsub.f32 %v3143_v40, %v1508_v11  ;;  %v3237_v3 = vsub.f32 %v3151_v43, %v1508_v11 }
 0x358   :  { %v3240_v4 = vsub.f32 %v3160_v50, %v1508_v11  ;;  %v3243_v8 = vsub.f32 %v3168_v12, %v1508_v11  ;;  %v3246_v30 = vsub.f32 %v3163_v51, %v1508_v11  ;;  %v3249_v37 = vsub.f32 %v3171_v56, %v1508_v11 }
 0x359   :  { %v3251_v41 = vsub.f32 %v1439_v2, %v1508_v11  ;;  %v3253_v14 = vsub.f32 %v1442_v10, %v1508_v11  ;;  %v3255_v40 = vsub.f32 %v1447_v6, %v1508_v11  ;;  %v3257_v43 = vsub.f32 %v1450_v13, %v1508_v11 }
 0x35a   :  { %v3259_v15 = vsub.f32 %v1455_v38, %v1508_v11  ;;  %v3261_v50 = vsub.f32 %v1458_v46, %v1508_v11  ;;  %v3263_v12 = vsub.f32 %v1463_v44, %v1508_v11  ;;  %v3265_v16 = vsub.f32 %v1466_v34, %v1508_v11 }
 0x35b   :  { %v1525_v51 = vmul.f32 %v3228_v0, %v3228_v0  ;;  %v1526_v56 = vmul.f32 %v3231_v20, %v3231_v20  ;;  %v1527_v2 = vmul.f32 %v3234_v1, %v3234_v1  ;;  %v1528_v6 = vmul.f32 %v3237_v3, %v3237_v3 }
 0x35c   :  { %v1529_v19 = vmul.f32 %v3240_v4, %v3240_v4  ;;  %v1530_v36 = vmul.f32 %v3243_v8, %v3243_v8  ;;  %v1531_v42 = vmul.f32 %v3246_v30, %v3246_v30  ;;  %v1532_v46 = vmul.f32 %v3249_v37, %v3249_v37 }
 0x35d   :  { %v1541_v10 = vsel %vm1173_vm6, %v1525_v51, 0.0  ;;  %v1542_v13 = vsel %vm1173_vm6, %v1526_v56, 0.0  ;;  %v1544_v53 = vsel %vm1173_vm6, %v1527_v2, 0.0  ;;  %v1546_v38 = vsel %vm1173_vm6, %v1528_v6, 0.0 }
 0x35e   :  { %v1543_v18 = vadd.f32 %v1542_v13, %v1541_v10  ;;  %v1548_v44 = vsel %vm1173_vm6, %v1529_v19, 0.0  ;;  %v1550_v47 = vsel %vm1173_vm6, %v1530_v36, 0.0  ;;  %v1533_v48 = vmul.f32 %v3251_v41, %v3251_v41 }
 0x35f   :  { %v1552_v49 = vsel %vm1173_vm6, %v1531_v42, 0.0  ;;  %v1534_v5 = vmul.f32 %v3253_v14, %v3253_v14  ;;  %v1554_v7 = vsel %vm1173_vm6, %v1532_v46, 0.0  ;;  %v1535_v52 = vmul.f32 %v3255_v40, %v3255_v40 }
 0x360   :  { %v1545_v21 = vadd.f32 %v1544_v53, %v1543_v18  ;;  %v1556_v32 = vsel %vm1173_vm6, %v1533_v48, 0.0  ;;  %v1536_v33 = vmul.f32 %v3257_v43, %v3257_v43  ;;  %v1537_v11 = vmul.f32 %v3259_v15, %v3259_v15 }
 0x361   :  { %v1558_v23 = vsel %vm1173_vm6, %v1534_v5, 0.0  ;;  %v1560_v51 = vsel %vm1173_vm6, %v1535_v52, 0.0  ;;  %v1538_v2 = vmul.f32 %v3261_v50, %v3261_v50  ;;  %v1539_v13 = vmul.f32 %v3263_v12, %v3263_v12 }
 0x362   :  { %v1547_v39 = vadd.f32 %v1546_v38, %v1545_v21  ;;  %v1562_v6 = vsel %vm1173_vm6, %v1536_v33, 0.0  ;;  %v1564_v18 = vsel %vm1173_vm6, %v1537_v11, 0.0  ;;  %v1540_v53 = vmul.f32 %v3265_v16, %v3265_v16 }
 0x363   :  { %v1566_v21 = vsel %vm1173_vm6, %v1538_v2, 0.0  ;;  %v1568_v38 = vsel %vm1173_vm6, %v1539_v13, 0.0 }
 0x364   :  { %v1549_v45 = vadd.f32 %v1548_v44, %v1547_v39  ;;  %v1570_v42 = vsel %vm1173_vm6, %v1540_v53, 0.0 }
 0x366   :  { %v1551_v34 = vadd.f32 %v1550_v47, %v1549_v45 }
 0x368   :  { %v1553_v28 = vadd.f32 %v1552_v49, %v1551_v34 }
 0x36a   :  { %v1555_v24 = vadd.f32 %v1554_v7, %v1553_v28  ;;  %v1932_v7 = vld [vmem:[%s3459_s11] ss:$0 sm:$0xff] }
 0x36b   :  { %v1784_v52 = vadd.f32 %v1932_v7, %v3181_v22  ;;  %v1808_v33 = vadd.f32 %v3187_v59, %v1932_v7  ;;  %v3326_v11 = vadd.f32 %v1932_v7, %v3193_v27  ;;  %v3335_v22 = vadd.f32 %v3199_v62, %v1932_v7  ;;  %v3343_v59 = vld [vmem:[%s3455_s7] ss:$0 sm:$0xff] }
 0x36c   :  { %v1557_v17 = vadd.f32 %v1556_v32, %v1555_v24  ;;  %v1792_v24 = vadd.f32 %v3179_v57, %v1932_v7  ;;  %v1795_v32 = vadd.f32 %v3183_v58, %v1932_v7  ;;  %v3332_v57 = vadd.f32 %v1932_v7, %v3197_v35 }
 0x36d   :  { %v3338_v58 = vadd.f32 %v1932_v7, %v3201_v63  ;;  %v3352_v27 = vadd.f32 %v3213_v26, %v1932_v7 }
 0x36e   :  { %v1559_v9 = vadd.f32 %v1558_v23, %v1557_v17  ;;  %v1787_v17 = vadd.f32 %v1932_v7, %v3185_v25  ;;  %v1800_v23 = vadd.f32 %v1932_v7, %v3189_v60  ;;  %v3346_v60 = vadd.f32 %v3207_v54, %v1932_v7  ;;  %v3364_v54 = vld [vmem:[%s3456_s8] ss:$0 sm:$0xff]  ;;  %s2450_s8 = smov [#allocation3]  }
 0x36f   :  { %s1883_s23 = sshll.u32 %s2450_s8, 4  ;;  %s1884_s23 = int_to_ptr.vmem [resolvable:$true] %s1883_s23 }
 0x370   :  { %v1561_v56 = vadd.f32 %v1560_v51, %v1559_v9  ;;  %v1811_v9 = vadd.f32 %v3191_v29, %v1932_v7  ;;  %v3329_v51 = vadd.f32 %v3195_v61, %v1932_v7  ;;  %v3349_v29 = vadd.f32 %v1932_v7, %v3209_v55  ;;  %s2417_s24 = scalar_lea.vmem %s1884_s23, 2048  ;;  %p2422_p1 = scmp.lt.s32.totalorder %s1884_s23, %s1884_s23 }
 0x371   :  { %v3355_v61 = vadd.f32 %v1932_v7, %v3215_v31  ;;  %p2418_p0 = scmp.ne.s32.totalorder %s1884_s23, %s2417_s24  ;;  %p2423_p2 = scmp.lt.s32.totalorder %s2417_s24, %s2417_s24 }
 0x372   :  { %v1563_v10 = vadd.f32 %v1562_v6, %v1561_v56 }
 0x373   :  { %p2424_p3 = por %p2423_p2, %p2422_p1 }
 0x374   :  { %v1565_v19 = vadd.f32 %v1564_v18, %v1563_v10 }
 0x375   :  { %p2425_p4 = pnand %p2424_p3, %p2418_p0 }
 0x376   :  { %v1567_v36 = vadd.f32 %v1566_v21, %v1565_v19 }
 0x378   :  { %v1569_v39 = vadd.f32 %v1568_v38, %v1567_v36 }
 0x37a   :  { %v1571_v44 = vadd.f32 %v1570_v42, %v1569_v39 }
 0x37c   :  { %v1572_v45 = vrot.slane %v1571_v44, 4 }
 0x37e   :  { %v1573_v46 = vadd.f32 %v1572_v45, %v1571_v44 }
 0x380   :  { %v1574_v47 = vrot.slane %v1573_v46, 2 }
 0x382   :  { %v1575_v34 = vadd.f32 %v1574_v47, %v1573_v46 }
 0x384   :  { %v1576_v48 = vrot.slane %v1575_v34, 1 }
 0x386   :  { %v1577_v49 = vadd.f32 %v1576_v48, %v1575_v34 }
 0x388   :  { %v1578_v28 = vmul.f32 0.0078125, %v1577_v49 }
 0x38a   :  { %v1579_v5 = vadd.f32 1e-05, %v1578_v28 }
 0x38c   :  { %2415 = vrsqrt.f32 %v1579_v5 }
 0x396   :  { %v2416_v25 = vpop.eup %2415 }
 0x397   :  { %v1594_v35 = vmul.f32 %v2416_v25, %v3261_v50  ;;  %v1583_v62 = vmul.f32 %v2416_v25, %v3234_v1  ;;  %v1581_v63 = vmul.f32 %v2416_v25, %v3228_v0  ;;  %v1584_v56 = vmul.f32 %v2416_v25, %v3237_v3 }
 0x398   :  { %v1582_v55 = vmul.f32 %v2416_v25, %v3231_v20  ;;  %v1587_v26 = vmul.f32 %v2416_v25, %v3246_v30  ;;  %v1585_v31 = vmul.f32 %v2416_v25, %v3240_v4  ;;  %v1588_v2 = vmul.f32 %v2416_v25, %v3249_v37 }
 0x399   :  { %v1616_v50 = vmul.f32 %v3343_v59, %v1594_v35  ;;  %v1605_v1 = vmul.f32 %v3343_v59, %v1583_v62  ;;  %v1603_v0 = vmul.f32 %v3343_v59, %v1581_v63  ;;  %v1606_v3 = vmul.f32 %v3343_v59, %v1584_v56 }
 0x39a   :  { %v1604_v6 = vmul.f32 %v3343_v59, %v1582_v55  ;;  %v1609_v10 = vmul.f32 %v3343_v59, %v1587_v26  ;;  %v1607_v20 = vmul.f32 %v3343_v59, %v1585_v31  ;;  %v1610_v30 = vmul.f32 %v3343_v59, %v1588_v2 }
 0x39b   :  { %v1627_v4 = vadd.f32 %v3364_v54, %v1605_v1  ;;  %v1625_v37 = vadd.f32 %v3364_v54, %v1603_v0  ;;  %v1628_v13 = vadd.f32 %v3364_v54, %v1606_v3  ;;  %v1586_v18 = vmul.f32 %v2416_v25, %v3243_v8 }
 0x39c   :  { %v1626_v19 = vadd.f32 %v3364_v54, %v1604_v6  ;;  %v1631_v53 = vadd.f32 %v3364_v54, %v1609_v10  ;;  %v1629_v21 = vadd.f32 %v3364_v54, %v1607_v20  ;;  %v1632_v36 = vadd.f32 %v3364_v54, %v1610_v30 }
 0x39d   :  { %v1643_v38 = vmax.f32 %v1627_v4, 0.0  ;;  %v1641_v39 = vmax.f32 %v1625_v37, 0.0  ;;  %v1644_v42 = vmax.f32 %v1628_v13, 0.0  ;;  %v1608_v44 = vmul.f32 %v3343_v59, %v1586_v18 }
 0x39e   :  { %v1642_v45 = vmax.f32 %v1626_v19, 0.0  ;;  %v1647_v46 = vmax.f32 %v1631_v53, 0.0  ;;  %v1645_v47 = vmax.f32 %v1629_v21, 0.0  ;;  %v1648_v34 = vmax.f32 %v1632_v36, 0.0 }
 0x39f   :  { %v1848_v48 = vadd.f32 %v1792_v24, %v1643_v38  ;;  %v1846_v49 = vadd.f32 %v1784_v52, %v1641_v39  ;;  %v1849_v8 = vadd.f32 %v1795_v32, %v1644_v42  ;;  %v1630_v28 = vadd.f32 %v3364_v54, %v1608_v44 }
 0x3a0   :  { %v1847_v5 = vadd.f32 %v1787_v17, %v1642_v45  ;;  %v1852_v7 = vadd.f32 %v1808_v33, %v1647_v46  ;;  %v1850_v35 = vadd.f32 %v1800_v23, %v1645_v47  ;;  %v1853_v62 = vadd.f32 %v1811_v9, %v1648_v34 }
 0x3a1   :  { %1864 = vst.msk [vmem:[#allocation3 + $0x10] sm:$0xff] %vm1173_vm6, %v1848_v48  ;;  %1862 = vst.msk [vmem:[#allocation3] sm:$0xff] %vm1173_vm6, %v1846_v49  ;;  %v1646_v63 = vmax.f32 %v1630_v28, 0.0  ;;  %v1591_v56 = vmul.f32 %v2416_v25, %v3255_v40  ;;  %v1589_v55 = vmul.f32 %v2416_v25, %v3251_v41  ;;  %v1592_v24 = vmul.f32 %v2416_v25, %v3257_v43 }
 0x3a2   :  { %1865 = vst.msk [vmem:[#allocation3 + $0x18] sm:$0xff] %vm1173_vm6, %v1849_v8  ;;  %1863 = vst.msk [vmem:[#allocation3 + $0x8] sm:$0xff] %vm1173_vm6, %v1847_v5  ;;  %v1590_v52 = vmul.f32 %v2416_v25, %v3253_v14  ;;  %v1595_v32 = vmul.f32 %v2416_v25, %v3263_v12  ;;  %v1593_v17 = vmul.f32 %v2416_v25, %v3259_v15 }
 0x3a3   :  { %1868 = vst.msk [vmem:[#allocation3 + $0x30] sm:$0xff] %vm1173_vm6, %v1852_v7  ;;  %1866 = vst.msk [vmem:[#allocation3 + $0x20] sm:$0xff] %vm1173_vm6, %v1850_v35  ;;  %v1596_v40 = vmul.f32 %v2416_v25, %v3265_v16  ;;  %v1851_v41 = vadd.f32 %v3326_v11, %v1646_v63  ;;  %v1613_v43 = vmul.f32 %v3343_v59, %v1591_v56 }
 0x3a4   :  { %1869 = vst.msk [vmem:[#allocation3 + $0x38] sm:$0xff] %vm1173_vm6, %v1853_v62  ;;  %v1611_v33 = vmul.f32 %v3343_v59, %v1589_v55  ;;  %v1614_v23 = vmul.f32 %v3343_v59, %v1592_v24  ;;  %v1612_v9 = vmul.f32 %v3343_v59, %v1590_v52  ;;  %v1617_v26 = vmul.f32 %v3343_v59, %v1595_v32 }
 0x3a5   :  { %v1615_v14 = vmul.f32 %v3343_v59, %v1593_v17  ;;  %v1618_v12 = vmul.f32 %v3343_v59, %v1596_v40  ;;  %1867 = vst.msk [vmem:[#allocation3 + $0x28] sm:$0xff] %vm1173_vm6, %v1851_v41  ;;  %v1635_v15 = vadd.f32 %v3364_v54, %v1613_v43  ;;  %v1638_v25 = vadd.f32 %v3364_v54, %v1616_v50 }
 0x3a6   :  { %v1633_v16 = vadd.f32 %v3364_v54, %v1611_v33  ;;  %v1636_v11 = vadd.f32 %v3364_v54, %v1614_v23  ;;  %v1634_v31 = vadd.f32 %v3364_v54, %v1612_v9  ;;  %v1639_v2 = vadd.f32 %v3364_v54, %v1617_v26 }
 0x3a7   :  { %v1637_v1 = vadd.f32 %v3364_v54, %v1615_v14  ;;  %v1640_v0 = vadd.f32 %v3364_v54, %v1618_v12  ;;  %v1651_v3 = vmax.f32 %v1635_v15, 0.0  ;;  %v1654_v10 = vmax.f32 %v1638_v25, 0.0 }
 0x3a8   :  { %v1649_v59 = vmax.f32 %v1633_v16, 0.0  ;;  %v1652_v6 = vmax.f32 %v1636_v11, 0.0  ;;  %v1650_v20 = vmax.f32 %v1634_v31, 0.0  ;;  %v1655_v30 = vmax.f32 %v1639_v2, 0.0 }
 0x3a9   :  { %v1653_v4 = vmax.f32 %v1637_v1, 0.0  ;;  %v1656_v37 = vmax.f32 %v1640_v0, 0.0  ;;  %v1856_v50 = vadd.f32 %v3329_v51, %v1651_v3  ;;  %v1859_v19 = vadd.f32 %v3355_v61, %v1654_v10 }
 0x3aa   :  { %v1854_v13 = vadd.f32 %v3332_v57, %v1649_v59  ;;  %v1857_v18 = vadd.f32 %v3335_v22, %v1652_v6  ;;  %v1855_v54 = vadd.f32 %v3338_v58, %v1650_v20  ;;  %v1860_v53 = vadd.f32 %v3346_v60, %v1655_v30 }
 0x3ab   :  { %v1858_v21 = vadd.f32 %v3349_v29, %v1653_v4  ;;  %v1861_v36 = vadd.f32 %v3352_v27, %v1656_v37  ;;  %1872 = vst.msk [vmem:[#allocation3 + $0x50] sm:$0xff] %vm1173_vm6, %v1856_v50  ;;  %1875 = vst.msk [vmem:[#allocation3 + $0x68] sm:$0xff] %vm1173_vm6, %v1859_v19 }
 0x3ac   :  { %1870 = vst.msk [vmem:[#allocation3 + $0x40] sm:$0xff] %vm1173_vm6, %v1854_v13  ;;  %1873 = vst.msk [vmem:[#allocation3 + $0x58] sm:$0xff] %vm1173_vm6, %v1857_v18 }
 0x3ad   :  { %1871 = vst.msk [vmem:[#allocation3 + $0x48] sm:$0xff] %vm1173_vm6, %v1855_v54  ;;  %1876 = vst.msk [vmem:[#allocation3 + $0x70] sm:$0xff] %vm1173_vm6, %v1860_v53 }
 0x3ae   :  { %1874 = vst.msk [vmem:[#allocation3 + $0x60] sm:$0xff] %vm1173_vm6, %v1858_v21  ;;  %1877 = vst.msk [vmem:[#allocation3 + $0x78] sm:$0xff] %vm1173_vm6, %v1861_v36 }
 0x3af   :  { %2428 = shalt.err (!%p2425_p4)
}
 0x3b0   :  { %s2429_s0 = scalar_lea.hbm %s3460_s12, 2048 }
 0x3b1   :  { %p2430_p5 = scmp.ne.s32.totalorder %s3460_s12, %s2429_s0  ;;  %p2433_p6 = scmp.lt.u32.totalorder %s2429_s0, %s3460_s12 }
 0x3b3   :  { %p2435_p7 = pnand %p2433_p6, %p2430_p5 }
 0x3b5   :  { %2438 = shalt.err (!%p2435_p7)
}
 0x3b6   :  { %s2451_s4 = smov 128  }
 0x3b7   :  { %1889 = dma.vmem_to_hbm [thread:$0]  %s1884_s23, 2048, %s3460_s12, [#allocation4], %s2451_s4, %s2451_s4, %s2443_s27  }
 0x3b8   :  { %2439 = dma.done.wait [#allocation4], 2048  }
 0x3b9   :  { %2440 = vsyncadd [#allocation4], 4294965248 }
 0x3ba   :  { %1893 = vsyncpa [#allocation4], 1 }

</bundles_post_ra>
